<compile_context>
chip_gen: v7x
topology: tpu7x:2x2x1
jax: 0.10.0
libtpu: 0.0.40
codegen_flags: <defaults>
</compile_context>

<pallas_src>
import jax
import jax.numpy as jnp
from jax import lax
from jax.experimental import pallas as pl
from jax.experimental.pallas import tpu as pltpu

LN_EPS = 1e-5  # nn.LayerNorm default


# ----------------------------------------------------------------------------
# VMEM budgeting / tile selection (per TPU generation).
# ----------------------------------------------------------------------------
def _vmem_limit_bytes():
    cap = 64 * 1024 * 1024
    try:  # trace-time hardware query; fall back to the v7x-safe value
        cap = int(getattr(pltpu.get_tpu_info(), "vmem_capacity_bytes", cap))
    except Exception:
        pass
    # 48 MiB scoped budget on v7x (64 MiB physical), 96 MiB on v5e/v6e (128 MiB).
    return min(int(cap * 0.75), 96 * 1024 * 1024)


def _divisor_tile(n, cap, unit):
    """Largest tile <= cap that divides n and is a multiple of `unit` (else n)."""
    if n <= cap:
        return n
    t = (min(cap, n) // unit) * unit
    while t >= unit:
        if n % t == 0:
            return t
        t -= unit
    return n


def _pick_q_tile(n, fea, d_ff, vmem_limit):
    """q-tile rows, accounting for the in-kernel f32 intermediates per row."""
    hard_cap = 128 if vmem_limit <= (48 << 20) else 256
    per_row = (2 * fea * 4        # x tile, double-buffered input DMA
               + 2 * n * 4        # s and p (tq, N) f32 softmax intermediates
               + 4 * fea * 4      # mha, h1, ffn-out, h2
               + d_ff * 4         # ffn hidden
               + fea * 4)         # output tile
    fixed = (2 * fea * d_ff * 2   # w_ff1 + w_ff2 bf16, single-buffered
             + 12 * fea * 4       # small weight vectors
             + 2 * 2 * n * 4      # kT / vT, double-buffered
             + (4 << 20))         # headroom
    budget = max(vmem_limit - fixed, per_row * 8)
    cap = max(8, min(hard_cap, budget // per_row))
    return _divisor_tile(n, cap, 8)


# ----------------------------------------------------------------------------
# Shared LayerNorm helper (used by the kernel and the pure-JAX reference).
# ----------------------------------------------------------------------------
def _layer_norm(h, gamma, beta):
    mu = jnp.mean(h, axis=-1, keepdims=True)
    d = h - mu
    var = jnp.mean(d * d, axis=-1, keepdims=True)
    return d * lax.rsqrt(var + LN_EPS) * gamma + beta


# ----------------------------------------------------------------------------
# Prologue: fused k|v projection (Fea -> 2), one read of x.
# ----------------------------------------------------------------------------
def _kv_proj_kernel(x_ref, wkv_ref, bkv_ref, kv_ref):
    kv_ref[0] = jnp.dot(x_ref[0], wkv_ref[...],
                        preferred_element_type=jnp.float32) + bkv_ref[...]


# ----------------------------------------------------------------------------
# Main kernel: rank-1 MHA (plain softmax over the full key row) -> LN1 ->
# FFN (bf16 MXU, f32 acc) -> LN2, one q-tile per grid step.
# ----------------------------------------------------------------------------
def _attention_kernel(x_ref, kT_ref, vT_ref,
                      wqT_ref, bq_ref, wo_ref, bo_ref,
                      g1_ref, b1_ref,
                      w1_ref, bf1_ref, w2_ref, bf2_ref,
                      g2_ref, b2_ref,
                      o_ref):
    x = x_ref[0]                                                    # (tq, F) f32

    # --- MHA with q = v = h = 1 (d_k = 1 -> scale = 1): all on the VPU/XLU ---
    q = jnp.sum(x * wqT_ref[...], axis=-1, keepdims=True) + bq_ref[...]   # (tq, 1)
    k_row = kT_ref[0]                                               # (1, N)
    v_row = vT_ref[0]                                               # (1, N)
    s = q * k_row                                                   # (tq, N) outer product
    m = jnp.max(s, axis=-1, keepdims=True)
    p = jnp.exp(s - m)
    l = jnp.sum(p, axis=-1, keepdims=True)
    ctx = jnp.sum(p * v_row, axis=-1, keepdims=True) / l            # (tq, 1)
    mha = ctx * wo_ref[...] + bo_ref[...]                           # (tq, F) outer product

    # dropout = identity (eval mode)
    h1 = _layer_norm(mha + x, g1_ref[...], b1_ref[...])             # LayerNorm1

    # --- PositionwiseFeedForward: Linear -> ReLU -> Linear (bf16 MXU, f32 acc) ---
    f = jnp.dot(h1.astype(jnp.bfloat16), w1_ref[...],
                preferred_element_type=jnp.float32) + bf1_ref[...]
    f = jnp.maximum(f, 0.0)
    f = jnp.dot(f.astype(jnp.bfloat16), w2_ref[...],
                preferred_element_type=jnp.float32) + bf2_ref[...]

    # dropout = identity (eval mode)
    o_ref[0] = _layer_norm(f + h1, g2_ref[...], b2_ref[...])        # LayerNorm2


def attention_forward(x_bfn, params):
    """PyTorch `Attention.forward` (eval mode). x_bfn: (B, Fea, N) -> (B, Fea, N)."""
    B, Fea, N = x_bfn.shape
    x = jnp.transpose(x_bfn, (0, 2, 1))                             # (B, N, Fea)
    vmem_limit = _vmem_limit_bytes()
    d_ff = params['w_ff1'].shape[1]

    # ---- k/v projection prologue (tiny (B, N, 2) output) ----
    tn = _divisor_tile(N, 512, 8)
    kv = pl.pallas_call(
        _kv_proj_kernel,
        out_shape=jax.ShapeDtypeStruct((B, N, 2), jnp.float32),
        grid_spec=pltpu.PrefetchScalarGridSpec(
            num_scalar_prefetch=0,
            grid=(B, N // tn),
            in_specs=[
                pl.BlockSpec((1, tn, Fea), lambda b, i: (b, i, 0)),
                pl.BlockSpec((Fea, 2), lambda b, i: (0, 0)),
                pl.BlockSpec((1, 2), lambda b, i: (0, 0)),
            ],
            out_specs=pl.BlockSpec((1, tn, 2), lambda b, i: (b, i, 0)),
        ),
        compiler_params=pltpu.CompilerParams(
            dimension_semantics=("parallel", "parallel"),
            vmem_limit_bytes=vmem_limit),
    )(x, params['w_kv'], params['b_kv'])
    kT = jnp.swapaxes(kv[..., 0:1], 1, 2)                           # (B, 1, N), ~8 KB/batch
    vT = jnp.swapaxes(kv[..., 1:2], 1, 2)                           # (B, 1, N)

    # ---- main attention + FFN kernel, grid = (B, q-tiles) ----
    tq = _pick_q_tile(N, Fea, d_ff, vmem_limit)

    def _const_spec(arr, single_buffer=False):
        idx = lambda b, qi, _n=arr.ndim: (0,) * _n
        if single_buffer:
            # constant-index weight blocks: no double-buffering (frees VMEM on v7x)
            return pl.BlockSpec(arr.shape, idx, pipeline_mode=pl.Buffered(1))
        return pl.BlockSpec(arr.shape, idx)

    w_args = (params['wqT'], params['bq'], params['wo'], params['bo'],
              params['g1'], params['b1'],
              params['w_ff1'], params['b_ff1'],
              params['w_ff2'], params['b_ff2'],
              params['g2'], params['b2'])
    big = {6, 8}  # w_ff1, w_ff2 (the only large blocks)
    w_specs = [_const_spec(a, single_buffer=(i in big)) for i, a in enumerate(w_args)]

    out = pl.pallas_call(
        _attention_kernel,
        out_shape=jax.ShapeDtypeStruct((B, N, Fea), jnp.float32),
        grid_spec=pltpu.PrefetchScalarGridSpec(
            num_scalar_prefetch=0,
            grid=(B, N // tq),
            in_specs=[
                pl.BlockSpec((1, tq, Fea), lambda b, qi: (b, qi, 0)),
                pl.BlockSpec((1, 1, N), lambda b, qi: (b, 0, 0)),
                pl.BlockSpec((1, 1, N), lambda b, qi: (b, 0, 0)),
            ] + w_specs,
            out_specs=pl.BlockSpec((1, tq, Fea), lambda b, qi: (b, qi, 0)),
        ),
        compiler_params=pltpu.CompilerParams(
            dimension_semantics=("parallel", "parallel"),
            vmem_limit_bytes=vmem_limit),
    )(x, kT, vT, *w_args)

    # TODO(synk): the permute back to PyTorch layout is an XLA transpose; writing
    # the output transposed from the kernel (block (1, Fea, tq)) would save one
    # HBM round trip at the cost of an in-kernel XLU transpose.
    return jnp.transpose(out, (0, 2, 1))                            # (B, Fea, N)


# ----------------------------------------------------------------------------
# Parameters (deterministic synthetic; shapes follow the module's __init__)
# and kernel-ready preparation.
# ----------------------------------------------------------------------------
def init_attention_params(key, fea, d_ff=None):
    # TODO(synk): the MHA and PositionwiseFeedForward classes are not given in the
    # source file; standard scaled-dot-product MHA (Linear q/k/v/out with bias,
    # d_k = q = 1 -> scale = 1) and Linear(Fea, d_ff)->ReLU->Linear(d_ff, Fea)
    # with d_ff = Fea are assumed.
    d_ff = fea if d_ff is None else d_ff

    def lin(k, din, dout):
        k1, k2 = jax.random.split(k)
        w = jax.random.normal(k1, (din, dout), jnp.float32) * (1.0 / din) ** 0.5
        b = 0.01 * jax.random.normal(k2, (1, dout), jnp.float32)
        return w, b

    keys = jax.random.split(key, 7)
    wq, bq = lin(keys[0], fea, 1)
    wk, bk = lin(keys[1], fea, 1)
    wv, bv = lin(keys[2], fea, 1)
    wo, bo = lin(keys[3], 1, fea)
    w_ff1, b_ff1 = lin(keys[4], fea, d_ff)
    w_ff2, b_ff2 = lin(keys[5], d_ff, fea)
    kg1, kb1, kg2, kb2 = jax.random.split(keys[6], 4)
    g1 = 1.0 + 0.05 * jax.random.normal(kg1, (1, fea), jnp.float32)
    b1 = 0.05 * jax.random.normal(kb1, (1, fea), jnp.float32)
    g2 = 1.0 + 0.05 * jax.random.normal(kg2, (1, fea), jnp.float32)
    b2 = 0.05 * jax.random.normal(kb2, (1, fea), jnp.float32)
    return dict(wq=wq, bq=bq, wk=wk, bk=bk, wv=wv, bv=bv, wo=wo, bo=bo,
                g1=g1, b1=b1, w_ff1=w_ff1, b_ff1=b_ff1,
                w_ff2=w_ff2, b_ff2=b_ff2, g2=g2, b2=b2)


def prepare_params(p):
    """Kernel-ready form: fused k|v projection, transposed wq, bf16 FFN weights."""
    out = dict(p)
    out['wqT'] = jnp.transpose(p['wq'])                              # (1, Fea), VPU reduce
    out['w_kv'] = jnp.concatenate([p['wk'], p['wv']], axis=1)        # (Fea, 2)
    out['b_kv'] = jnp.concatenate([p['bk'], p['bv']], axis=1)        # (1, 2)
    # TODO(synk): bf16 FFN weights/activations deviate ~1e-2 rel from the f32
    # PyTorch reference; acceptable for inference.
    out['w_ff1'] = p['w_ff1'].astype(jnp.bfloat16)
    out['w_ff2'] = p['w_ff2'].astype(jnp.bfloat16)
    for name in ('wq', 'wk', 'bk', 'wv', 'bv'):
        out.pop(name)
    return out


# ----------------------------------------------------------------------------
# Pure-JAX reference of the module's eval-mode forward (same prepared params).
# ----------------------------------------------------------------------------
def attention_ref(x_bfn, p):
    x = jnp.transpose(x_bfn, (0, 2, 1)).astype(jnp.float32)         # (B, N, Fea)
    q = jnp.sum(x * p['wqT'], axis=-1, keepdims=True) + p['bq']     # (B, N, 1)
    kv = x @ p['w_kv'] + p['b_kv']                                   # (B, N, 2)
    k, v = kv[..., 0:1], kv[..., 1:2]
    s = jnp.einsum('bnd,bmd->bnm', q, k)                             # d_k = 1 -> scale = 1
    a = jax.nn.softmax(s, axis=-1)
    ctx = jnp.einsum('bnm,bmd->bnd', a, v)
    mha = ctx * p['wo'] + p['bo']
    h1 = _layer_norm(mha + x, p['g1'], p['b1'])
    f = jnp.maximum(h1 @ p['w_ff1'].astype(jnp.float32) + p['b_ff1'], 0.0)
    f = f @ p['w_ff2'].astype(jnp.float32) + p['b_ff2']
    h2 = _layer_norm(f + h1, p['g2'], p['b2'])
    return jnp.transpose(h2, (0, 2, 1))


if __name__ == "__main__":
    # Small shapes consistent with Attention(Fea).forward(x: (B, Fea, N)).
    # (The encoder in the source uses Fea = 1024, N = 2048.)
    B, FEA, N = 2, 64, 256
    key = jax.random.PRNGKey(0)
    kp, kx = jax.random.split(key)
    params = prepare_params(init_attention_params(kp, FEA))
    x = jax.random.normal(kx, (B, FEA, N), jnp.float32)

    out = jax.jit(attention_forward)(x, params)
    jax.block_until_ready(out)

    assert out.shape == (B, FEA, N), out.shape
    assert bool(jnp.all(jnp.isfinite(out)))

    ref = attention_ref(x, params)
    max_err = float(jnp.max(jnp.abs(out - ref)))
    assert max_err < 1e-1, max_err   # bf16 FFN activations vs f32 reference
    print("KERNEL_OK")
</pallas_src>

<mosaic_0001>
module attributes {stable_mosaic.version = 11 : i64} {
  func.func @_kv_proj_kernel(%arg0: i32, %arg1: i32, %arg2: memref<1x256x64xf32, #tpu.memory_space<vmem>>, %arg3: memref<64x2xf32, #tpu.memory_space<vmem>>, %arg4: memref<1x2xf32, #tpu.memory_space<vmem>>, %arg5: memref<1x256x2xf32, #tpu.memory_space<vmem>>) attributes {dimension_semantics = [#tpu.dimension_semantics<parallel>, #tpu.dimension_semantics<parallel>], iteration_bounds = array<i64: 2, 1>, scalar_prefetch = 0 : i64, scratch_operands = 0 : i64, tpu.core_type = #tpu.core_type<tc>, window_params = [{transform_indices = @transform_0, window_bounds = array<i64: 1, 256, 64>}, {pipeline_mode = #tpu.pipeline_mode<synchronous>, transform_indices = @transform_1, window_bounds = array<i64: 64, 2>}, {pipeline_mode = #tpu.pipeline_mode<synchronous>, transform_indices = @transform_2, window_bounds = array<i64: 1, 2>}, {transform_indices = @transform_3, window_bounds = array<i64: 1, 256, 2>}]} {
    %c0 = arith.constant 0 : index
    %c0_0 = arith.constant 0 : index
    %c0_1 = arith.constant 0 : index
    %0 = vector.load %arg2[%c0, %c0_0, %c0_1] : memref<1x256x64xf32, #tpu.memory_space<vmem>>, vector<1x256x64xf32>
    %1 = vector.shape_cast %0 : vector<1x256x64xf32> to vector<256x64xf32>
    %c0_2 = arith.constant 0 : index
    %c0_3 = arith.constant 0 : index
    %2 = vector.load %arg3[%c0_2, %c0_3] : memref<64x2xf32, #tpu.memory_space<vmem>>, vector<64x2xf32>
    %cst = arith.constant dense<0.000000e+00> : vector<256x2xf32>
    %3 = tpu.matmul %1, %2, %cst {dimension_numbers = #tpu.dot_dimension_numbers<[1], [0], [0], [1], [0, 0, 1, 1], [], []>} : vector<256x64xf32>, vector<64x2xf32>, vector<256x2xf32> -> vector<256x2xf32>
    %c0_4 = arith.constant 0 : index
    %c0_5 = arith.constant 0 : index
    %4 = vector.load %arg4[%c0_4, %c0_5] : memref<1x2xf32, #tpu.memory_space<vmem>>, vector<1x2xf32>
    %5 = vector.broadcast %4 : vector<1x2xf32> to vector<256x2xf32>
    %6 = arith.addf %3, %5 : vector<256x2xf32>
    %c0_6 = arith.constant 0 : index
    %c0_7 = arith.constant 0 : index
    %c0_8 = arith.constant 0 : index
    %7 = vector.load %arg5[%c0_6, %c0_7, %c0_8] : memref<1x256x2xf32, #tpu.memory_space<vmem>>, vector<1x256x2xf32>
    %8 = vector.shape_cast %7 : vector<1x256x2xf32> to vector<256x2xf32>
    %9 = vector.shape_cast %6 : vector<256x2xf32> to vector<1x256x2xf32>
    tpu.vector_store %arg5[%c0_6, %c0_7, %c0_8], %9 {strides = array<i32>} : memref<1x256x2xf32, #tpu.memory_space<vmem>>, vector<1x256x2xf32>,
    return
  }
  func.func @transform_0(%arg0: i32, %arg1: i32) -> (i32, i32, i32) {
    %c0_i32 = arith.constant 0 : i32
    %c0_i32_0 = arith.constant 0 : i32
    return %arg0, %arg1, %c0_i32 : i32, i32, i32
  }
  func.func @transform_1(%arg0: i32, %arg1: i32) -> (i32, i32) {
    %c0_i32 = arith.constant 0 : i32
    %c0_i32_0 = arith.constant 0 : i32
    %c0_i32_1 = arith.constant 0 : i32
    return %c0_i32, %c0_i32_0 : i32, i32
  }
  func.func @transform_2(%arg0: i32, %arg1: i32) -> (i32, i32) {
    %c0_i32 = arith.constant 0 : i32
    %c0_i32_0 = arith.constant 0 : i32
    %c0_i32_1 = arith.constant 0 : i32
    return %c0_i32, %c0_i32_0 : i32, i32
  }
  func.func @transform_3(%arg0: i32, %arg1: i32) -> (i32, i32, i32) {
    %c0_i32 = arith.constant 0 : i32
    %c0_i32_0 = arith.constant 0 : i32
    return %arg0, %arg1, %c0_i32 : i32, i32, i32
  }
}

module attributes {stable_mosaic.version = 11 : i64} {
  func.func @_attention_kernel(%arg0: i32, %arg1: i32, %arg2: memref<1x128x64xf32, #tpu.memory_space<vmem>>, %arg3: memref<1x1x256xf32, #tpu.memory_space<vmem>>, %arg4: memref<1x1x256xf32, #tpu.memory_space<vmem>>, %arg5: memref<1x64xf32, #tpu.memory_space<vmem>>, %arg6: memref<1x1xf32, #tpu.memory_space<vmem>>, %arg7: memref<1x64xf32, #tpu.memory_space<vmem>>, %arg8: memref<1x64xf32, #tpu.memory_space<vmem>>, %arg9: memref<1x64xf32, #tpu.memory_space<vmem>>, %arg10: memref<1x64xf32, #tpu.memory_space<vmem>>, %arg11: memref<64x64xbf16, #tpu.memory_space<vmem>>, %arg12: memref<1x64xf32, #tpu.memory_space<vmem>>, %arg13: memref<64x64xbf16, #tpu.memory_space<vmem>>, %arg14: memref<1x64xf32, #tpu.memory_space<vmem>>, %arg15: memref<1x64xf32, #tpu.memory_space<vmem>>, %arg16: memref<1x64xf32, #tpu.memory_space<vmem>>, %arg17: memref<1x128x64xf32, #tpu.memory_space<vmem>>) attributes {dimension_semantics = [#tpu.dimension_semantics<parallel>, #tpu.dimension_semantics<parallel>], iteration_bounds = array<i64: 2, 2>, scalar_prefetch = 0 : i64, scratch_operands = 0 : i64, tpu.core_type = #tpu.core_type<tc>, window_params = [{transform_indices = @transform_0, window_bounds = array<i64: 1, 128, 64>}, {transform_indices = @transform_1, window_bounds = array<i64: 1, 1, 256>}, {transform_indices = @transform_2, window_bounds = array<i64: 1, 1, 256>}, {pipeline_mode = #tpu.pipeline_mode<synchronous>, transform_indices = @transform_3, window_bounds = array<i64: 1, 64>}, {pipeline_mode = #tpu.pipeline_mode<synchronous>, transform_indices = @transform_4, window_bounds = array<i64: 1, 1>}, {pipeline_mode = #tpu.pipeline_mode<synchronous>, transform_indices = @transform_5, window_bounds = array<i64: 1, 64>}, {pipeline_mode = #tpu.pipeline_mode<synchronous>, transform_indices = @transform_6, window_bounds = array<i64: 1, 64>}, {pipeline_mode = #tpu.pipeline_mode<synchronous>, transform_indices = @transform_7, window_bounds = array<i64: 1, 64>}, {pipeline_mode = #tpu.pipeline_mode<synchronous>, transform_indices = @transform_8, window_bounds = array<i64: 1, 64>}, {pipeline_mode = #tpu.pipeline_mode<synchronous>, transform_indices = @transform_9, window_bounds = array<i64: 64, 64>}, {pipeline_mode = #tpu.pipeline_mode<synchronous>, transform_indices = @transform_10, window_bounds = array<i64: 1, 64>}, {pipeline_mode = #tpu.pipeline_mode<synchronous>, transform_indices = @transform_11, window_bounds = array<i64: 64, 64>}, {pipeline_mode = #tpu.pipeline_mode<synchronous>, transform_indices = @transform_12, window_bounds = array<i64: 1, 64>}, {pipeline_mode = #tpu.pipeline_mode<synchronous>, transform_indices = @transform_13, window_bounds = array<i64: 1, 64>}, {pipeline_mode = #tpu.pipeline_mode<synchronous>, transform_indices = @transform_14, window_bounds = array<i64: 1, 64>}, {transform_indices = @transform_15, window_bounds = array<i64: 1, 128, 64>}]} {
    %c0 = arith.constant 0 : index
    %c0_0 = arith.constant 0 : index
    %c0_1 = arith.constant 0 : index
    %0 = vector.load %arg2[%c0, %c0_0, %c0_1] : memref<1x128x64xf32, #tpu.memory_space<vmem>>, vector<1x128x64xf32>
    %1 = vector.shape_cast %0 : vector<1x128x64xf32> to vector<128x64xf32>
    %c0_2 = arith.constant 0 : index
    %c0_3 = arith.constant 0 : index
    %2 = vector.load %arg5[%c0_2, %c0_3] : memref<1x64xf32, #tpu.memory_space<vmem>>, vector<1x64xf32>
    %3 = vector.broadcast %2 : vector<1x64xf32> to vector<128x64xf32>
    %4 = arith.mulf %1, %3 : vector<128x64xf32>
    %cst = arith.constant dense<0.000000e+00> : vector<128xf32>
    %5 = vector.multi_reduction <add>, %4, %cst [1] : vector<128x64xf32> to vector<128xf32>
    %6 = vector.shape_cast %5 : vector<128xf32> to vector<128x1xf32>
    %c0_4 = arith.constant 0 : index
    %c0_5 = arith.constant 0 : index
    %7 = vector.load %arg6[%c0_4, %c0_5] : memref<1x1xf32, #tpu.memory_space<vmem>>, vector<1x1xf32>
    %8 = vector.broadcast %7 : vector<1x1xf32> to vector<128x1xf32>
    %9 = arith.addf %6, %8 : vector<128x1xf32>
    %c0_6 = arith.constant 0 : index
    %c0_7 = arith.constant 0 : index
    %c0_8 = arith.constant 0 : index
    %10 = vector.load %arg3[%c0_6, %c0_7, %c0_8] : memref<1x1x256xf32, #tpu.memory_space<vmem>>, vector<1x1x256xf32>
    %11 = vector.shape_cast %10 : vector<1x1x256xf32> to vector<1x256xf32>
    %c0_9 = arith.constant 0 : index
    %c0_10 = arith.constant 0 : index
    %c0_11 = arith.constant 0 : index
    %12 = vector.load %arg4[%c0_9, %c0_10, %c0_11] : memref<1x1x256xf32, #tpu.memory_space<vmem>>, vector<1x1x256xf32>
    %13 = vector.shape_cast %12 : vector<1x1x256xf32> to vector<1x256xf32>
    %14 = vector.broadcast %9 : vector<128x1xf32> to vector<128x256xf32>
    %15 = vector.broadcast %11 : vector<1x256xf32> to vector<128x256xf32>
    %16 = arith.mulf %14, %15 : vector<128x256xf32>
    %cst_12 = arith.constant dense<0xFF800000> : vector<128xf32>
    %17 = vector.multi_reduction <maximumf>, %16, %cst_12 [1] : vector<128x256xf32> to vector<128xf32>
    %18 = vector.shape_cast %17 : vector<128xf32> to vector<128x1xf32>
    %19 = vector.broadcast %18 : vector<128x1xf32> to vector<128x256xf32>
    %20 = arith.subf %16, %19 : vector<128x256xf32>
    %21 = math.exp %20 : vector<128x256xf32>
    %cst_13 = arith.constant dense<0.000000e+00> : vector<128xf32>
    %22 = vector.multi_reduction <add>, %21, %cst_13 [1] : vector<128x256xf32> to vector<128xf32>
    %23 = vector.shape_cast %22 : vector<128xf32> to vector<128x1xf32>
    %24 = vector.broadcast %13 : vector<1x256xf32> to vector<128x256xf32>
    %25 = arith.mulf %21, %24 : vector<128x256xf32>
    %cst_14 = arith.constant dense<0.000000e+00> : vector<128xf32>
    %26 = vector.multi_reduction <add>, %25, %cst_14 [1] : vector<128x256xf32> to vector<128xf32>
    %27 = vector.shape_cast %26 : vector<128xf32> to vector<128x1xf32>
    %28 = arith.divf %27, %23 : vector<128x1xf32>
    %c0_15 = arith.constant 0 : index
    %c0_16 = arith.constant 0 : index
    %29 = vector.load %arg7[%c0_15, %c0_16] : memref<1x64xf32, #tpu.memory_space<vmem>>, vector<1x64xf32>
    %30 = vector.broadcast %28 : vector<128x1xf32> to vector<128x64xf32>
    %31 = vector.broadcast %29 : vector<1x64xf32> to vector<128x64xf32>
    %32 = arith.mulf %30, %31 : vector<128x64xf32>
    %c0_17 = arith.constant 0 : index
    %c0_18 = arith.constant 0 : index
    %33 = vector.load %arg8[%c0_17, %c0_18] : memref<1x64xf32, #tpu.memory_space<vmem>>, vector<1x64xf32>
    %34 = vector.broadcast %33 : vector<1x64xf32> to vector<128x64xf32>
    %35 = arith.addf %32, %34 : vector<128x64xf32>
    %36 = arith.addf %35, %1 : vector<128x64xf32>
    %c0_19 = arith.constant 0 : index
    %c0_20 = arith.constant 0 : index
    %37 = vector.load %arg9[%c0_19, %c0_20] : memref<1x64xf32, #tpu.memory_space<vmem>>, vector<1x64xf32>
    %c0_21 = arith.constant 0 : index
    %c0_22 = arith.constant 0 : index
    %38 = vector.load %arg10[%c0_21, %c0_22] : memref<1x64xf32, #tpu.memory_space<vmem>>, vector<1x64xf32>
    %cst_23 = arith.constant dense<0.000000e+00> : vector<128xf32>
    %39 = vector.multi_reduction <add>, %36, %cst_23 [1] : vector<128x64xf32> to vector<128xf32>
    %40 = vector.shape_cast %39 : vector<128xf32> to vector<128x1xf32>
    %cst_24 = arith.constant 6.400000e+01 : f32
    %41 = vector.broadcast %cst_24 : f32 to vector<128x1xf32>
    %42 = arith.divf %40, %41 : vector<128x1xf32>
    %43 = vector.broadcast %42 : vector<128x1xf32> to vector<128x64xf32>
    %44 = arith.subf %36, %43 : vector<128x64xf32>
    %45 = arith.mulf %44, %44 : vector<128x64xf32>
    %cst_25 = arith.constant dense<0.000000e+00> : vector<128xf32>
    %46 = vector.multi_reduction <add>, %45, %cst_25 [1] : vector<128x64xf32> to vector<128xf32>
    %47 = vector.shape_cast %46 : vector<128xf32> to vector<128x1xf32>
    %cst_26 = arith.constant 6.400000e+01 : f32
    %48 = vector.broadcast %cst_26 : f32 to vector<128x1xf32>
    %49 = arith.divf %47, %48 : vector<128x1xf32>
    %cst_27 = arith.constant 9.99999974E-6 : f32
    %50 = vector.broadcast %cst_27 : f32 to vector<128x1xf32>
    %51 = arith.addf %49, %50 : vector<128x1xf32>
    %52 = math.rsqrt %51 : vector<128x1xf32>
    %53 = vector.broadcast %52 : vector<128x1xf32> to vector<128x64xf32>
    %54 = arith.mulf %44, %53 : vector<128x64xf32>
    %55 = vector.broadcast %37 : vector<1x64xf32> to vector<128x64xf32>
    %56 = arith.mulf %54, %55 : vector<128x64xf32>
    %57 = vector.broadcast %38 : vector<1x64xf32> to vector<128x64xf32>
    %58 = arith.addf %56, %57 : vector<128x64xf32>
    %59 = arith.truncf %58 : vector<128x64xf32> to vector<128x64xbf16>
    %c0_28 = arith.constant 0 : index
    %c0_29 = arith.constant 0 : index
    %60 = vector.load %arg11[%c0_28, %c0_29] : memref<64x64xbf16, #tpu.memory_space<vmem>>, vector<64x64xbf16>
    %cst_30 = arith.constant dense<0.000000e+00> : vector<128x64xf32>
    %61 = tpu.matmul %59, %60, %cst_30 {dimension_numbers = #tpu.dot_dimension_numbers<[1], [0], [0], [1], [0, 0, 1, 1], [], []>} : vector<128x64xbf16>, vector<64x64xbf16>, vector<128x64xf32> -> vector<128x64xf32>
    %c0_31 = arith.constant 0 : index
    %c0_32 = arith.constant 0 : index
    %62 = vector.load %arg12[%c0_31, %c0_32] : memref<1x64xf32, #tpu.memory_space<vmem>>, vector<1x64xf32>
    %63 = vector.broadcast %62 : vector<1x64xf32> to vector<128x64xf32>
    %64 = arith.addf %61, %63 : vector<128x64xf32>
    %cst_33 = arith.constant 0.000000e+00 : f32
    %65 = vector.broadcast %cst_33 : f32 to vector<128x64xf32>
    %66 = arith.maximumf %64, %65 : vector<128x64xf32>
    %67 = arith.truncf %66 : vector<128x64xf32> to vector<128x64xbf16>
    %c0_34 = arith.constant 0 : index
    %c0_35 = arith.constant 0 : index
    %68 = vector.load %arg13[%c0_34, %c0_35] : memref<64x64xbf16, #tpu.memory_space<vmem>>, vector<64x64xbf16>
    %cst_36 = arith.constant dense<0.000000e+00> : vector<128x64xf32>
    %69 = tpu.matmul %67, %68, %cst_36 {dimension_numbers = #tpu.dot_dimension_numbers<[1], [0], [0], [1], [0, 0, 1, 1], [], []>} : vector<128x64xbf16>, vector<64x64xbf16>, vector<128x64xf32> -> vector<128x64xf32>
    %c0_37 = arith.constant 0 : index
    %c0_38 = arith.constant 0 : index
    %70 = vector.load %arg14[%c0_37, %c0_38] : memref<1x64xf32, #tpu.memory_space<vmem>>, vector<1x64xf32>
    %71 = vector.broadcast %70 : vector<1x64xf32> to vector<128x64xf32>
    %72 = arith.addf %69, %71 : vector<128x64xf32>
    %73 = arith.addf %72, %58 : vector<128x64xf32>
    %c0_39 = arith.constant 0 : index
    %c0_40 = arith.constant 0 : index
    %74 = vector.load %arg15[%c0_39, %c0_40] : memref<1x64xf32, #tpu.memory_space<vmem>>, vector<1x64xf32>
    %c0_41 = arith.constant 0 : index
    %c0_42 = arith.constant 0 : index
    %75 = vector.load %arg16[%c0_41, %c0_42] : memref<1x64xf32, #tpu.memory_space<vmem>>, vector<1x64xf32>
    %cst_43 = arith.constant dense<0.000000e+00> : vector<128xf32>
    %76 = vector.multi_reduction <add>, %73, %cst_43 [1] : vector<128x64xf32> to vector<128xf32>
    %77 = vector.shape_cast %76 : vector<128xf32> to vector<128x1xf32>
    %cst_44 = arith.constant 6.400000e+01 : f32
    %78 = vector.broadcast %cst_44 : f32 to vector<128x1xf32>
    %79 = arith.divf %77, %78 : vector<128x1xf32>
    %80 = vector.broadcast %79 : vector<128x1xf32> to vector<128x64xf32>
    %81 = arith.subf %73, %80 : vector<128x64xf32>
    %82 = arith.mulf %81, %81 : vector<128x64xf32>
    %cst_45 = arith.constant dense<0.000000e+00> : vector<128xf32>
    %83 = vector.multi_reduction <add>, %82, %cst_45 [1] : vector<128x64xf32> to vector<128xf32>
    %84 = vector.shape_cast %83 : vector<128xf32> to vector<128x1xf32>
    %cst_46 = arith.constant 6.400000e+01 : f32
    %85 = vector.broadcast %cst_46 : f32 to vector<128x1xf32>
    %86 = arith.divf %84, %85 : vector<128x1xf32>
    %cst_47 = arith.constant 9.99999974E-6 : f32
    %87 = vector.broadcast %cst_47 : f32 to vector<128x1xf32>
    %88 = arith.addf %86, %87 : vector<128x1xf32>
    %89 = math.rsqrt %88 : vector<128x1xf32>
    %90 = vector.broadcast %89 : vector<128x1xf32> to vector<128x64xf32>
    %91 = arith.mulf %81, %90 : vector<128x64xf32>
    %92 = vector.broadcast %74 : vector<1x64xf32> to vector<128x64xf32>
    %93 = arith.mulf %91, %92 : vector<128x64xf32>
    %94 = vector.broadcast %75 : vector<1x64xf32> to vector<128x64xf32>
    %95 = arith.addf %93, %94 : vector<128x64xf32>
    %c0_48 = arith.constant 0 : index
    %c0_49 = arith.constant 0 : index
    %c0_50 = arith.constant 0 : index
    %96 = vector.load %arg17[%c0_48, %c0_49, %c0_50] : memref<1x128x64xf32, #tpu.memory_space<vmem>>, vector<1x128x64xf32>
    %97 = vector.shape_cast %96 : vector<1x128x64xf32> to vector<128x64xf32>
    %98 = vector.shape_cast %95 : vector<128x64xf32> to vector<1x128x64xf32>
    tpu.vector_store %arg17[%c0_48, %c0_49, %c0_50], %98 {strides = array<i32>} : memref<1x128x64xf32, #tpu.memory_space<vmem>>, vector<1x128x64xf32>,
    return
  }
  func.func @transform_0(%arg0: i32, %arg1: i32) -> (i32, i32, i32) {
    %c0_i32 = arith.constant 0 : i32
    %c0_i32_0 = arith.constant 0 : i32
    return %arg0, %arg1, %c0_i32 : i32, i32, i32
  }
  func.func @transform_1(%arg0: i32, %arg1: i32) -> (i32, i32, i32) {
    %c0_i32 = arith.constant 0 : i32
    %c0_i32_0 = arith.constant 0 : i32
    %c0_i32_1 = arith.constant 0 : i32
    return %arg0, %c0_i32, %c0_i32_0 : i32, i32, i32
  }
  func.func @transform_2(%arg0: i32, %arg1: i32) -> (i32, i32, i32) {
    %c0_i32 = arith.constant 0 : i32
    %c0_i32_0 = arith.constant 0 : i32
    %c0_i32_1 = arith.constant 0 : i32
    return %arg0, %c0_i32, %c0_i32_0 : i32, i32, i32
  }
  func.func @transform_3(%arg0: i32, %arg1: i32) -> (i32, i32) {
    %c0_i32 = arith.constant 0 : i32
    %c0_i32_0 = arith.constant 0 : i32
    %c0_i32_1 = arith.constant 0 : i32
    return %c0_i32, %c0_i32_0 : i32, i32
  }
  func.func @transform_4(%arg0: i32, %arg1: i32) -> (i32, i32) {
    %c0_i32 = arith.constant 0 : i32
    %c0_i32_0 = arith.constant 0 : i32
    %c0_i32_1 = arith.constant 0 : i32
    return %c0_i32, %c0_i32_0 : i32, i32
  }
  func.func @transform_5(%arg0: i32, %arg1: i32) -> (i32, i32) {
    %c0_i32 = arith.constant 0 : i32
    %c0_i32_0 = arith.constant 0 : i32
    %c0_i32_1 = arith.constant 0 : i32
    return %c0_i32, %c0_i32_0 : i32, i32
  }
  func.func @transform_6(%arg0: i32, %arg1: i32) -> (i32, i32) {
    %c0_i32 = arith.constant 0 : i32
    %c0_i32_0 = arith.constant 0 : i32
    %c0_i32_1 = arith.constant 0 : i32
    return %c0_i32, %c0_i32_0 : i32, i32
  }
  func.func @transform_7(%arg0: i32, %arg1: i32) -> (i32, i32) {
    %c0_i32 = arith.constant 0 : i32
    %c0_i32_0 = arith.constant 0 : i32
    %c0_i32_1 = arith.constant 0 : i32
    return %c0_i32, %c0_i32_0 : i32, i32
  }
  func.func @transform_8(%arg0: i32, %arg1: i32) -> (i32, i32) {
    %c0_i32 = arith.constant 0 : i32
    %c0_i32_0 = arith.constant 0 : i32
    %c0_i32_1 = arith.constant 0 : i32
    return %c0_i32, %c0_i32_0 : i32, i32
  }
  func.func @transform_9(%arg0: i32, %arg1: i32) -> (i32, i32) {
    %c0_i32 = arith.constant 0 : i32
    %c0_i32_0 = arith.constant 0 : i32
    %c0_i32_1 = arith.constant 0 : i32
    return %c0_i32, %c0_i32_0 : i32, i32
  }
  func.func @transform_10(%arg0: i32, %arg1: i32) -> (i32, i32) {
    %c0_i32 = arith.constant 0 : i32
    %c0_i32_0 = arith.constant 0 : i32
    %c0_i32_1 = arith.constant 0 : i32
    return %c0_i32, %c0_i32_0 : i32, i32
  }
  func.func @transform_11(%arg0: i32, %arg1: i32) -> (i32, i32) {
    %c0_i32 = arith.constant 0 : i32
    %c0_i32_0 = arith.constant 0 : i32
    %c0_i32_1 = arith.constant 0 : i32
    return %c0_i32, %c0_i32_0 : i32, i32
  }
  func.func @transform_12(%arg0: i32, %arg1: i32) -> (i32, i32) {
    %c0_i32 = arith.constant 0 : i32
    %c0_i32_0 = arith.constant 0 : i32
    %c0_i32_1 = arith.constant 0 : i32
    return %c0_i32, %c0_i32_0 : i32, i32
  }
  func.func @transform_13(%arg0: i32, %arg1: i32) -> (i32, i32) {
    %c0_i32 = arith.constant 0 : i32
    %c0_i32_0 = arith.constant 0 : i32
    %c0_i32_1 = arith.constant 0 : i32
    return %c0_i32, %c0_i32_0 : i32, i32
  }
  func.func @transform_14(%arg0: i32, %arg1: i32) -> (i32, i32) {
    %c0_i32 = arith.constant 0 : i32
    %c0_i32_0 = arith.constant 0 : i32
    %c0_i32_1 = arith.constant 0 : i32
    return %c0_i32, %c0_i32_0 : i32, i32
  }
  func.func @transform_15(%arg0: i32, %arg1: i32) -> (i32, i32, i32) {
    %c0_i32 = arith.constant 0 : i32
    %c0_i32_0 = arith.constant 0 : i32
    return %arg0, %arg1, %c0_i32 : i32, i32, i32
  }
}

</mosaic_0001>

<bundles_post_ra>
// kernel: attention_forward.2
= control target key start
LH: loop header
LB: loop body
LE: loop exit
PB: predicated region body
PF: predicated region fallthrough
CT: control target
= control target key end

     0   :  { %s941_s12 = smov 0   ;;  %s943_s13 = smov 0   ;;  %s1174_s0 = inlined_call_operand.vmem [shape: f32[2,256,64], index: 0, kind: input, shape index: {}]   ;;  %s1175_s1 = inlined_call_operand.vmem [shape: f32[64,2], index: 1, kind: input, shape index: {}]   ;;  %s1176_s2 = inlined_call_operand.vmem [shape: f32[1,2], index: 2, kind: input, shape index: {}]   ;;  %s1177_s3 = inlined_call_operand.vmem [shape: f32[2,256,2], index: 3, kind: output, shape index: {}]  }
   0x1   :  { %s945_s14 = smov 0  }
   0x2 LB: > { %s25_s15 = sadd.s32 1, %s915_s13  ;;  %p703_p0 = scmp.ge.s32.totalorder %s919_s14, 1  ;;  %s919_s14 = sphi %s945_s14, %s13_s14   ;;  %s915_s13 = sphi %s943_s13, %s1179_s13   ;;  %s911_s12 = sphi %s941_s12, %s1178_s12  }
   0x3   : > { %p27_p1 = scmp.ge.s32.totalorder %s25_s15, 2  ;;  %p158_p2 = scmp.lt.s32.totalorder %s919_s14, 3 }
   0x5   : > { %s1181_s15 = smov (%p27_p1, %s25_s15), 0  ;;  %p159_p3 = pnand %p703_p0, %p158_p2 }
   0x6   : > { %v242_v0 = vld [vmem:[%s1175_s1] sm:$0xff] (!%p159_p3)  ;;  %v243_v1 = vld [vmem:[%s1175_s1 + $0x8] sm:$0xff] (!%p159_p3)  ;;  %v244_v2 = vld [vmem:[%s1175_s1 + $0x10] sm:$0xff] (!%p159_p3)  ;;  %p191_p4 = scmp.lt.s32.totalorder (!%p159_p3), %s911_s12, 1  ;;  %vm257_vm0 = vcmask (!%p159_p3), 523264   ;;  %vm579_vm1 = vcmask (!%p159_p3), 15360  }
   0x7   : > { %162 = sbr.rel (%p159_p3) target bundleno = 270 (0x10e), region = 32  ;;  %v849_v3 = vpack.c.bf16 (!%p159_p3), %v243_v1, %v242_v0  ;;  %v245_v4 = vld [vmem:[%s1175_s1 + $0x18] sm:$0xff] (!%p159_p3)  ;;  %v246_v6 = vld [vmem:[%s1175_s1 + $0x20] sm:$0xff] (!%p159_p3)  ;;  %v247_v7 = vld [vmem:[%s1175_s1 + $0x28] sm:$0xff] (!%p159_p3) }
   0x8   : > { %v853_v5 = vpack.c.bf16 (!%p159_p3), %v245_v4, %v244_v2  ;;  %v857_v8 = vpack.c.bf16 (!%p159_p3), %v247_v7, %v246_v6  ;;  %v248_v9 = vld [vmem:[%s1175_s1 + $0x30] sm:$0xff] (!%p159_p3)  ;;  %v249_v10 = vld [vmem:[%s1175_s1 + $0x38] sm:$0xff] (!%p159_p3)  ;;  %v1060_v44 = vld [vmem:[%s1176_s2] ss:$0 sm:$0xff] (!%p159_p3) }
   0x9   : > { %850 = vmatprep.subr.bf16.mxu0 (!%p159_p3), %v849_v3  ;;  %865 = vmatprep.subr.bf16.mxu1 (!%p159_p3), %v849_v3  ;;  %v861_v13 = vpack.c.bf16 (!%p159_p3), %v249_v10, %v248_v9 }
   0xa   : > { %852 = vmatpush3.bf16.msra.mxu0 (!%p159_p3), %v849_v3  ;;  %869 = vmatpush3.bf16.msra.mxu1 (!%p159_p3), %v849_v3 }
   0xb   : > { %854 = vmatprep.subr.bf16.mxu0 (!%p159_p3), %v853_v5  ;;  %866 = vmatprep.subr.bf16.mxu1 (!%p159_p3), %v853_v5 }
   0xe   : > { %s1183_s12 = smov (!%p191_p4, %s911_s12), 1  ;;  %856 = vmatpush3.bf16.msra.mxu0 %v853_v5  ;;  %870 = vmatpush3.bf16.msra.mxu1 %v853_v5 }
   0xf   : > { %s743_s28 = sshll.u32 %s1183_s12, 8  ;;  %858 = vmatprep.subr.bf16.mxu0 %v857_v8  ;;  %867 = vmatprep.subr.bf16.mxu1 %v857_v8 }
  0x10   : > { %s988_s6 = scalar_lea.vmem %s1174_s0, %s743_s28  ;;  %s1067_s17 = scalar_lea.vmem %s1177_s3, %s743_s28 }
  0x11   : > { %v210_v11 = vld [vmem:[%s988_s6] sm:$0xff]  ;;  %v211_v14 = vld [vmem:[%s988_s6 + $0x8] sm:$0xff]  ;;  %v212_v16 = vld [vmem:[%s988_s6 + $0x10] sm:$0xff] }
  0x12   : > { %v226_v12 = vld [vmem:[%s988_s6 + $0x80] sm:$0xff]  ;;  %801 = vmatprep.mubr.msk.f32.mxu0 %vm257_vm0, %v210_v11  ;;  %860 = vmatpush3.bf16.msra.mxu0 %v857_v8  ;;  %v227_v15 = vld [vmem:[%s988_s6 + $0x88] sm:$0xff]  ;;  %v228_v17 = vld [vmem:[%s988_s6 + $0x90] sm:$0xff] }
  0x13   : > { %825 = vmatprep.mubr.msk.f32.mxu1 %vm257_vm0, %v226_v12  ;;  %871 = vmatpush3.bf16.msra.mxu1 %v857_v8  ;;  %v213_v18 = vld [vmem:[%s988_s6 + $0x18] sm:$0xff]  ;;  %v214_v20 = vld [vmem:[%s988_s6 + $0x20] sm:$0xff]  ;;  %v215_v22 = vld [vmem:[%s988_s6 + $0x28] sm:$0xff] }
  0x14   : > { %862 = vmatprep.subr.bf16.mxu0 %v861_v13  ;;  %868 = vmatprep.subr.bf16.mxu1 %v861_v13  ;;  %v229_v19 = vld [vmem:[%s988_s6 + $0x98] sm:$0xff]  ;;  %v230_v21 = vld [vmem:[%s988_s6 + $0xa0] sm:$0xff]  ;;  %v231_v23 = vld [vmem:[%s988_s6 + $0xa8] sm:$0xff] }
  0x15   : > { %v216_v24 = vld [vmem:[%s988_s6 + $0x30] sm:$0xff]  ;;  %v217_v26 = vld [vmem:[%s988_s6 + $0x38] sm:$0xff]  ;;  %v218_v28 = vld [vmem:[%s988_s6 + $0x40] sm:$0xff] }
  0x16   : > { %864 = vmatpush3.bf16.msra.mxu0 %v861_v13  ;;  %v232_v25 = vld [vmem:[%s988_s6 + $0xb0] sm:$0xff]  ;;  %v233_v27 = vld [vmem:[%s988_s6 + $0xb8] sm:$0xff]  ;;  %v234_v29 = vld [vmem:[%s988_s6 + $0xc0] sm:$0xff] }
  0x17   : > { %872 = vmatpush3.bf16.msra.mxu1 %v861_v13  ;;  %v219_v30 = vld [vmem:[%s988_s6 + $0x48] sm:$0xff]  ;;  %v220_v32 = vld [vmem:[%s988_s6 + $0x50] sm:$0xff]  ;;  %v221_v34 = vld [vmem:[%s988_s6 + $0x58] sm:$0xff] }
  0x18   : > { %v235_v31 = vld [vmem:[%s988_s6 + $0xc8] sm:$0xff]  ;;  %v236_v33 = vld [vmem:[%s988_s6 + $0xd0] sm:$0xff]  ;;  %v237_v35 = vld [vmem:[%s988_s6 + $0xd8] sm:$0xff] }
  0x19   : > { %802 = vmatmul.mubr.msk.f32.vlgmr.msra.gmra.mrb[0].mxu0 %vm257_vm0, %v211_v14  ;;  %v222_v36 = vld [vmem:[%s988_s6 + $0x60] sm:$0xff]  ;;  %v223_v38 = vld [vmem:[%s988_s6 + $0x68] sm:$0xff]  ;;  %v224_v40 = vld [vmem:[%s988_s6 + $0x70] sm:$0xff] }
  0x1a   : > { %826 = vmatmul.mubr.msk.f32.vlgmr.msra.gmra.mrb[0].mxu1 %vm257_vm0, %v227_v15  ;;  %804 = vmatprep.mubr.msk.f32.mxu0 %vm257_vm0, %v212_v16  ;;  %v238_v37 = vld [vmem:[%s988_s6 + $0xe0] sm:$0xff]  ;;  %v239_v39 = vld [vmem:[%s988_s6 + $0xe8] sm:$0xff]  ;;  %v240_v41 = vld [vmem:[%s988_s6 + $0xf0] sm:$0xff] }
  0x1b   : > { %828 = vmatprep.mubr.msk.f32.mxu1 %vm257_vm0, %v228_v17  ;;  %v225_v42 = vld [vmem:[%s988_s6 + $0x78] sm:$0xff] }
  0x1c   : > { %v241_v43 = vld [vmem:[%s988_s6 + $0xf8] sm:$0xff] }
  0x1d   : > { %805 = vmatmul.mubr.msk.f32.gmra.mrb[2].mxu0 %vm257_vm0, %v213_v18 }
  0x1e   : > { %829 = vmatmul.mubr.msk.f32.gmra.mrb[2].mxu1 %vm257_vm0, %v229_v19  ;;  %807 = vmatprep.mubr.msk.f32.mxu0 %vm257_vm0, %v214_v20 }
  0x1f   : > { %831 = vmatprep.mubr.msk.f32.mxu1 %vm257_vm0, %v230_v21 }
  0x21   : > { %808 = vmatmul.mubr.msk.f32.gmra.mrb[4].mxu0 %vm257_vm0, %v215_v22 }
  0x22   : > { %832 = vmatmul.mubr.msk.f32.gmra.mrb[4].mxu1 %vm257_vm0, %v231_v23  ;;  %810 = vmatprep.mubr.msk.f32.mxu0 %vm257_vm0, %v216_v24 }
  0x23   : > { %834 = vmatprep.mubr.msk.f32.mxu1 %vm257_vm0, %v232_v25 }
  0x25   : > { %811 = vmatmul.mubr.msk.f32.gmra.mrb[6].mxu0 %vm257_vm0, %v217_v26 }
  0x26   : > { %835 = vmatmul.mubr.msk.f32.gmra.mrb[6].mxu1 %vm257_vm0, %v233_v27  ;;  %813 = vmatprep.mubr.msk.f32.mxu0 %vm257_vm0, %v218_v28 }
  0x27   : > { %837 = vmatprep.mubr.msk.f32.mxu1 %vm257_vm0, %v234_v29 }
  0x29   : > { %814 = vmatmul.mubr.msk.f32.gmra.mrb[8].mxu0 %vm257_vm0, %v219_v30 }
  0x2a   : > { %838 = vmatmul.mubr.msk.f32.gmra.mrb[8].mxu1 %vm257_vm0, %v235_v31  ;;  %816 = vmatprep.mubr.msk.f32.mxu0 %vm257_vm0, %v220_v32 }
  0x2b   : > { %840 = vmatprep.mubr.msk.f32.mxu1 %vm257_vm0, %v236_v33 }
  0x2d   : > { %817 = vmatmul.mubr.msk.f32.gmra.mrb[10].mxu0 %vm257_vm0, %v221_v34 }
  0x2e   : > { %841 = vmatmul.mubr.msk.f32.gmra.mrb[10].mxu1 %vm257_vm0, %v237_v35  ;;  %819 = vmatprep.mubr.msk.f32.mxu0 %vm257_vm0, %v222_v36 }
  0x2f   : > { %843 = vmatprep.mubr.msk.f32.mxu1 %vm257_vm0, %v238_v37 }
  0x31   : > { %820 = vmatmul.mubr.msk.f32.gmra.mrb[12].mxu0 %vm257_vm0, %v223_v38 }
  0x32   : > { %844 = vmatmul.mubr.msk.f32.gmra.mrb[12].mxu1 %vm257_vm0, %v239_v39  ;;  %822 = vmatprep.mubr.msk.f32.mxu0 %vm257_vm0, %v224_v40 }
  0x33   : > { %846 = vmatprep.mubr.msk.f32.mxu1 %vm257_vm0, %v240_v41 }
  0x35   : > { %823 = vmatmul.mubr.msk.f32.gmra.mrb[14].mxu0 %vm257_vm0, %v225_v42 }
  0x36   : > { %847 = vmatmul.mubr.msk.f32.gmra.mrb[14].mxu1 %vm257_vm0, %v241_v43 }
  0xec   : > { %v803_v45 = vpop.f32.mrb[0].mxu0 }
  0xed   : > { %v827_v46 = vpop.f32.mrb[0].mxu1  ;;  %v426_v47 = vadd.f32 %v803_v45, %v1060_v44  ;;  %v420_v49 = vpop.f32.mrb[1].mxu0 }
  0xee   : > { %v506_v48 = vadd.f32 %v827_v46, %v1060_v44  ;;  %v500_v50 = vpop.f32.mrb[1].mxu1  ;;  %v421_v51 = vadd.f32 %v1060_v44, %v420_v49 }
  0xef   : > { %v501_v52 = vadd.f32 %v1060_v44, %v500_v50  ;;  %581 = vst.msk [vmem:[%s1067_s17 + $0x8] sm:$0xff] %vm579_vm1, %v426_v47 }
  0xf0   : > { %597 = vst.msk [vmem:[%s1067_s17 + $0x88] sm:$0xff] %vm579_vm1, %v506_v48  ;;  %580 = vst.msk [vmem:[%s1067_s17] sm:$0xff] %vm579_vm1, %v421_v51  ;;  %v806_v53 = vpop.f32.mrb[2].mxu0 }
  0xf1   : > { %596 = vst.msk [vmem:[%s1067_s17 + $0x80] sm:$0xff] %vm579_vm1, %v501_v52  ;;  %v830_v54 = vpop.f32.mrb[2].mxu1  ;;  %v436_v55 = vadd.f32 %v806_v53, %v1060_v44  ;;  %v430_v57 = vpop.f32.mrb[3].mxu0 }
  0xf2   : > { %v516_v56 = vadd.f32 %v830_v54, %v1060_v44  ;;  %v510_v58 = vpop.f32.mrb[3].mxu1  ;;  %v431_v59 = vadd.f32 %v1060_v44, %v430_v57 }
  0xf3   : > { %v511_v60 = vadd.f32 %v1060_v44, %v510_v58  ;;  %583 = vst.msk [vmem:[%s1067_s17 + $0x18] sm:$0xff] %vm579_vm1, %v436_v55 }
  0xf4   : > { %599 = vst.msk [vmem:[%s1067_s17 + $0x98] sm:$0xff] %vm579_vm1, %v516_v56  ;;  %582 = vst.msk [vmem:[%s1067_s17 + $0x10] sm:$0xff] %vm579_vm1, %v431_v59  ;;  %v809_v61 = vpop.f32.mrb[4].mxu0 }
  0xf5   : > { %598 = vst.msk [vmem:[%s1067_s17 + $0x90] sm:$0xff] %vm579_vm1, %v511_v60  ;;  %v833_v62 = vpop.f32.mrb[4].mxu1  ;;  %v446_v63 = vadd.f32 %v809_v61, %v1060_v44  ;;  %v440_v1 = vpop.f32.mrb[5].mxu0 }
  0xf6   : > { %v526_v0 = vadd.f32 %v833_v62, %v1060_v44  ;;  %v520_v2 = vpop.f32.mrb[5].mxu1  ;;  %v441_v3 = vadd.f32 %v1060_v44, %v440_v1 }
  0xf7   : > { %v521_v4 = vadd.f32 %v1060_v44, %v520_v2  ;;  %585 = vst.msk [vmem:[%s1067_s17 + $0x28] sm:$0xff] %vm579_vm1, %v446_v63 }
  0xf8   : > { %601 = vst.msk [vmem:[%s1067_s17 + $0xa8] sm:$0xff] %vm579_vm1, %v526_v0  ;;  %584 = vst.msk [vmem:[%s1067_s17 + $0x20] sm:$0xff] %vm579_vm1, %v441_v3  ;;  %v812_v5 = vpop.f32.mrb[6].mxu0 }
  0xf9   : > { %600 = vst.msk [vmem:[%s1067_s17 + $0xa0] sm:$0xff] %vm579_vm1, %v521_v4  ;;  %v836_v6 = vpop.f32.mrb[6].mxu1  ;;  %v456_v7 = vadd.f32 %v812_v5, %v1060_v44  ;;  %v450_v9 = vpop.f32.mrb[7].mxu0 }
  0xfa   : > { %v536_v8 = vadd.f32 %v836_v6, %v1060_v44  ;;  %v530_v10 = vpop.f32.mrb[7].mxu1  ;;  %v451_v11 = vadd.f32 %v1060_v44, %v450_v9 }
  0xfb   : > { %v531_v12 = vadd.f32 %v1060_v44, %v530_v10  ;;  %587 = vst.msk [vmem:[%s1067_s17 + $0x38] sm:$0xff] %vm579_vm1, %v456_v7 }
  0xfc   : > { %603 = vst.msk [vmem:[%s1067_s17 + $0xb8] sm:$0xff] %vm579_vm1, %v536_v8  ;;  %586 = vst.msk [vmem:[%s1067_s17 + $0x30] sm:$0xff] %vm579_vm1, %v451_v11  ;;  %v815_v13 = vpop.f32.mrb[8].mxu0 }
  0xfd   : > { %602 = vst.msk [vmem:[%s1067_s17 + $0xb0] sm:$0xff] %vm579_vm1, %v531_v12  ;;  %v839_v14 = vpop.f32.mrb[8].mxu1  ;;  %v466_v15 = vadd.f32 %v815_v13, %v1060_v44  ;;  %v460_v17 = vpop.f32.mrb[9].mxu0 }
  0xfe   : > { %v546_v16 = vadd.f32 %v839_v14, %v1060_v44  ;;  %v540_v18 = vpop.f32.mrb[9].mxu1  ;;  %v461_v19 = vadd.f32 %v1060_v44, %v460_v17 }
  0xff   : > { %v541_v20 = vadd.f32 %v1060_v44, %v540_v18  ;;  %589 = vst.msk [vmem:[%s1067_s17 + $0x48] sm:$0xff] %vm579_vm1, %v466_v15 }
 0x100   : > { %605 = vst.msk [vmem:[%s1067_s17 + $0xc8] sm:$0xff] %vm579_vm1, %v546_v16  ;;  %588 = vst.msk [vmem:[%s1067_s17 + $0x40] sm:$0xff] %vm579_vm1, %v461_v19  ;;  %v818_v21 = vpop.f32.mrb[10].mxu0 }
 0x101   : > { %604 = vst.msk [vmem:[%s1067_s17 + $0xc0] sm:$0xff] %vm579_vm1, %v541_v20  ;;  %v842_v22 = vpop.f32.mrb[10].mxu1  ;;  %v476_v23 = vadd.f32 %v818_v21, %v1060_v44  ;;  %v470_v25 = vpop.f32.mrb[11].mxu0 }
 0x102   : > { %v556_v24 = vadd.f32 %v842_v22, %v1060_v44  ;;  %v550_v26 = vpop.f32.mrb[11].mxu1  ;;  %v471_v27 = vadd.f32 %v1060_v44, %v470_v25 }
 0x103   : > { %v551_v28 = vadd.f32 %v1060_v44, %v550_v26  ;;  %591 = vst.msk [vmem:[%s1067_s17 + $0x58] sm:$0xff] %vm579_vm1, %v476_v23 }
 0x104   : > { %607 = vst.msk [vmem:[%s1067_s17 + $0xd8] sm:$0xff] %vm579_vm1, %v556_v24  ;;  %590 = vst.msk [vmem:[%s1067_s17 + $0x50] sm:$0xff] %vm579_vm1, %v471_v27  ;;  %v821_v29 = vpop.f32.mrb[12].mxu0 }
 0x105   : > { %606 = vst.msk [vmem:[%s1067_s17 + $0xd0] sm:$0xff] %vm579_vm1, %v551_v28  ;;  %v845_v30 = vpop.f32.mrb[12].mxu1  ;;  %v486_v31 = vadd.f32 %v821_v29, %v1060_v44  ;;  %v480_v33 = vpop.f32.mrb[13].mxu0 }
 0x106   : > { %v566_v32 = vadd.f32 %v845_v30, %v1060_v44  ;;  %v560_v34 = vpop.f32.mrb[13].mxu1  ;;  %v481_v35 = vadd.f32 %v1060_v44, %v480_v33 }
 0x107   : > { %v561_v36 = vadd.f32 %v1060_v44, %v560_v34  ;;  %593 = vst.msk [vmem:[%s1067_s17 + $0x68] sm:$0xff] %vm579_vm1, %v486_v31 }
 0x108   : > { %609 = vst.msk [vmem:[%s1067_s17 + $0xe8] sm:$0xff] %vm579_vm1, %v566_v32  ;;  %592 = vst.msk [vmem:[%s1067_s17 + $0x60] sm:$0xff] %vm579_vm1, %v481_v35  ;;  %v824_v37 = vpop.f32.mrb[14].mxu0 }
 0x109   : > { %608 = vst.msk [vmem:[%s1067_s17 + $0xe0] sm:$0xff] %vm579_vm1, %v561_v36  ;;  %v848_v38 = vpop.f32.mrb[14].mxu1  ;;  %v496_v39 = vadd.f32 %v824_v37, %v1060_v44  ;;  %v490_v41 = vpop.f32.mrb[15].mxu0 }
 0x10a   : > { %v576_v40 = vadd.f32 %v848_v38, %v1060_v44  ;;  %v570_v42 = vpop.f32.mrb[15].mxu1  ;;  %v491_v43 = vadd.f32 %v1060_v44, %v490_v41 }
 0x10b   : > { %v571_v45 = vadd.f32 %v1060_v44, %v570_v42  ;;  %595 = vst.msk [vmem:[%s1067_s17 + $0x78] sm:$0xff] %vm579_vm1, %v496_v39 }
 0x10c   : > { %611 = vst.msk [vmem:[%s1067_s17 + $0xf8] sm:$0xff] %vm579_vm1, %v576_v40  ;;  %594 = vst.msk [vmem:[%s1067_s17 + $0x70] sm:$0xff] %vm579_vm1, %v491_v43 }
 0x10d   : > { %610 = vst.msk [vmem:[%s1067_s17 + $0xf0] sm:$0xff] %vm579_vm1, %v571_v45 }
 0x10e PF: > { %s13_s14 = sadd.s32 1, %s919_s14   ;;  %s1178_s12 = smov %s915_s13 }
 0x10f   : > { %p10_p5 = scmp.ge.s32.totalorder %s13_s14, 4   ;;  %s1179_s13 = smov %s1181_s15 }
 0x111   :  { %12 = sbr.rel (!%p10_p5) target bundleno = 2 (0x2), region = 62 }

// kernel: attention_forward.3
= control target key start
LH: loop header
LB: loop body
LE: loop exit
PB: predicated region body
PF: predicated region fallthrough
CT: control target
= control target key end

     0   :  { %s2660_s20 = smov 0   ;;  %s2662_s21 = smov 0   ;;  %s3697_s0 = inlined_call_operand.vmem [shape: f32[2,256,64], index: 0, kind: input, shape index: {}]   ;;  %s3698_s1 = inlined_call_operand.vmem [shape: f32[2,1,256], index: 1, kind: input, shape index: {}]   ;;  %s3699_s2 = inlined_call_operand.vmem [shape: f32[2,1,256], index: 2, kind: input, shape index: {}]   ;;  %s3700_s3 = inlined_call_operand.vmem [shape: f32[1,64], index: 3, kind: input, shape index: {}]   ;;  %s3701_s4 = inlined_call_operand.<no memory space> [shape: f32[1,1], index: 4, kind: input, shape index: {}]   ;;  %s3702_s5 = inlined_call_operand.vmem [shape: f32[1,64], index: 5, kind: input, shape index: {}]   ;;  %s3703_s6 = inlined_call_operand.vmem [shape: f32[1,64], index: 6, kind: input, shape index: {}]   ;;  %s3704_s7 = inlined_call_operand.vmem [shape: f32[1,64], index: 7, kind: input, shape index: {}]   ;;  %s3705_s8 = inlined_call_operand.vmem [shape: f32[1,64], index: 8, kind: input, shape index: {}]   ;;  %s3706_s9 = inlined_call_operand.vmem [shape: bf16[64,64], index: 9, kind: input, shape index: {}]   ;;  %s3707_s10 = inlined_call_operand.vmem [shape: f32[1,64], index: 10, kind: input, shape index: {}]   ;;  %s3708_s11 = inlined_call_operand.vmem [shape: bf16[64,64], index: 11, kind: input, shape index: {}]   ;;  %s3709_s12 = inlined_call_operand.vmem [shape: f32[1,64], index: 12, kind: input, shape index: {}]   ;;  %s3710_s13 = inlined_call_operand.vmem [shape: f32[1,64], index: 13, kind: input, shape index: {}]   ;;  %s3711_s14 = inlined_call_operand.vmem [shape: f32[1,64], index: 14, kind: input, shape index: {}]   ;;  %s3712_s15 = inlined_call_operand.vmem [shape: f32[2,256,64], index: 15, kind: output, shape index: {}]  }
   0x1   :  { %v20_v0 = vstv %s3701_s4  ;;  %s2664_s22 = smov 0   ;;  %s2666_s23 = smov 0  }
   0x2   :  { %21 = vst [vmem:[#allocation2] sm:$0x1] %v20_v0  ;;  %s2668_s24 = smov 0  }
   0x3 LB: > { %s36_s4 = sadd.s32 1, %s2566_s22  ;;  %s39_s25 = sadd.s32 1, %s2570_s23  ;;  %s2574_s24 = sphi %s2668_s24, %s27_s24   ;;  %s2570_s23 = sphi %s2666_s23, %s3720_s23   ;;  %s2566_s22 = sphi %s2664_s22, %s3719_s22   ;;  %s2562_s21 = sphi %s2662_s21, %s3718_s21   ;;  %s2558_s20 = sphi %s2660_s20, %s3717_s20  }
   0x4   : > { %p37_p0 = scmp.ge.s32.totalorder %s36_s4, 2  ;;  %p2195_p1 = scmp.ge.s32.totalorder %s2574_s24, 1 }
   0x5   : > { %p478_p2 = scmp.lt.s32.totalorder %s2574_s24, 5 }
   0x6   : > { %s3722_s4 = smov (%p37_p0, %s36_s4), 0  ;;  %s3724_s25 = smov (!%p37_p0, %s39_s25), %s2570_s23 }
   0x7   : > { %3713 = sst [smem:[#allocation3_spill]] %s3722_s4  ;;  %p479_p3 = pnand %p2195_p1, %p478_p2 }
   0x8   : > { %p41_p4 = scmp.ge.s32.totalorder %s3724_s25, 2  ;;  %s2196_s26 = sshll.u32 (!%p479_p3), %s2558_s20, 4  ;;  %v765_v1 = vlaneseq (!%p479_p3)  ;;  %v2699_v3 = vld [vmem:[%s3700_s3] ss:$0 sm:$0xff] (!%p479_p3)  ;;  %vm610_vm0 = vcmask (!%p479_p3), 523264   ;;  %v2576_v45 = vmov (!%p479_p3), 0  }
   0x9   : > { %482 = sbr.rel (%p479_p3) target bundleno = 1763 (0x6e3), region = 80  ;;  %p543_p5 = scmp.lt.s32.totalorder (!%p479_p3), %s2562_s21, 1  ;;  %2353 = vset.pattern.permute.xlu0 (!%p479_p3), %v2576_v45  ;;  %2354 = vset.pattern.permute.xlu1 (!%p479_p3), %v2576_v45  ;;  %v2205_v58 = vld [vmem:[#allocation2] ss:$0 sm:$0xff] (!%p479_p3) }
   0xa   : > { %s3726_s25 = smov (%p41_p4, %s3724_s25), 0  ;;  %p545_p6 = scmp.lt.s32.totalorder (!%p479_p3), %s2196_s26, 31  ;;  %v2692_v2 = vshrl.u32 (!%p479_p3), %v765_v1, 7 }
   0xb   : > { %3714 = sst [smem:[#allocation4_spill]] %s3726_s25 }
   0xc   : > { %v767_v4 = vsub.s32 (!%p479_p3), 0, %v2692_v2  ;;  %v771_v5 = vsub.s32 (!%p479_p3), 1, %v2692_v2 }
  0x10   : > { %s3728_s21 = smov (!%p543_p5, %s2562_s21), 1  ;;  %s3730_s26 = smov (!%p545_p6, %s2196_s26), 31 }
  0x11   : > { %s2197_s27 = sshll.u32 %s3728_s21, 5  ;;  %s2199_s28 = sshll.u32 %s3728_s21, 1 }
  0x12   : > { %s2701_s16 = sadd.s32 %s2197_s27, %s3730_s26  ;;  %s559_s20 = scalar_lea.vmem %s3699_s2, %s2199_s28 }
  0x13   : > { %s2198_s17 = sshll.u32 %s2701_s16, 3  ;;  %v683_v6 = vld [vmem:[%s559_s20] sm:$0x3]  ;;  %s555_s26 = scalar_lea.vmem %s3698_s1, %s2199_s28 }
  0x14   : > { %s2716_s29 = scalar_lea.vmem %s3697_s0, %s2198_s17  ;;  %v2721_v8 = vrot.slane %v683_v6, %v767_v4  ;;  %v2725_v9 = vrot.slane %v683_v6, %v771_v5  ;;  %s3603_s27 = scalar_lea.vmem %s3712_s15, %s2198_s17 }
  0x15   : > { %v573_v7 = vld [vmem:[%s2716_s29 + $0x10] sm:$0xff]  ;;  %v2728_v10 = vld [vmem:[%s2716_s29] sm:$0xff]  ;;  %v2731_v11 = vld [vmem:[%s2716_s29 + $0x18] sm:$0xff] }
  0x16   : > { %v596_v12 = vmul.f32 %v2699_v3, %v573_v7  ;;  %v594_v13 = vmul.f32 %v2699_v3, %v2728_v10  ;;  %v597_v14 = vmul.f32 %v2699_v3, %v2731_v11  ;;  %v2739_v15 = vld [vmem:[%s2716_s29 + $0x8] sm:$0xff]  ;;  %v575_v18 = vld [vmem:[%s2716_s29 + $0x20] sm:$0xff]  ;;  %v578_v21 = vld [vmem:[%s2716_s29 + $0x38] sm:$0xff] }
  0x17   : > { %v595_v16 = vmul.f32 %v2699_v3, %v2739_v15  ;;  %v576_v17 = vld [vmem:[%s2716_s29 + $0x28] sm:$0xff]  ;;  %v598_v25 = vmul.f32 %v2699_v3, %v575_v18  ;;  %v577_v26 = vld [vmem:[%s2716_s29 + $0x30] sm:$0xff]  ;;  %v601_v28 = vmul.f32 %v2699_v3, %v578_v21  ;;  %v579_v32 = vld [vmem:[%s2716_s29 + $0x40] sm:$0xff] }
  0x18   : > { %v617_v19 = vsel %vm610_vm0, %v596_v12, 0.0  ;;  %v611_v20 = vsel %vm610_vm0, %v594_v13, 0.0  ;;  %v620_v22 = vsel %vm610_vm0, %v597_v14, 0.0  ;;  %v599_v24 = vmul.f32 %v2699_v3, %v576_v17  ;;  %v580_v31 = vld [vmem:[%s2716_s29 + $0x48] sm:$0xff]  ;;  %v582_v37 = vld [vmem:[%s2716_s29 + $0x58] sm:$0xff]  ;;  %v581_v38 = vld [vmem:[%s2716_s29 + $0x50] sm:$0xff] }
  0x19   : > { %618 = vadd.xlane.f32.xlu1 %v617_v19  ;;  %612 = vadd.xlane.f32.xlu0 %v611_v20  ;;  %v614_v23 = vsel %vm610_vm0, %v595_v16, 0.0  ;;  %v623_v29 = vsel %vm610_vm0, %v598_v25, 0.0  ;;  %v600_v30 = vmul.f32 %v2699_v3, %v577_v26  ;;  %v632_v33 = vsel %vm610_vm0, %v601_v28, 0.0  ;;  %v584_v43 = vld [vmem:[%s2716_s29 + $0x68] sm:$0xff]  ;;  %v583_v44 = vld [vmem:[%s2716_s29 + $0x60] sm:$0xff]  ;;  %v586_v50 = vld [vmem:[%s2716_s29 + $0x78] sm:$0xff] }
  0x1a   : > { %v626_v27 = vsel %vm610_vm0, %v599_v24, 0.0  ;;  %v603_v34 = vmul.f32 %v2699_v3, %v580_v31  ;;  %v602_v36 = vmul.f32 %v2699_v3, %v579_v32  ;;  %v605_v40 = vmul.f32 %v2699_v3, %v582_v37  ;;  %v585_v51 = vld [vmem:[%s2716_s29 + $0x70] sm:$0xff] }
  0x1b   : > { %v629_v35 = vsel %vm610_vm0, %v600_v30, 0.0  ;;  %v604_v42 = vmul.f32 %v2699_v3, %v581_v38  ;;  %v607_v47 = vmul.f32 %v2699_v3, %v584_v43  ;;  %v606_v49 = vmul.f32 %v2699_v3, %v583_v44 }
  0x1c   : > { %v638_v39 = vsel %vm610_vm0, %v603_v34, 0.0  ;;  %v635_v41 = vsel %vm610_vm0, %v602_v36, 0.0  ;;  %v644_v46 = vsel %vm610_vm0, %v605_v40, 0.0  ;;  %v609_v53 = vmul.f32 %v2699_v3, %v586_v50 }
  0x1d   : > { %621 = vadd.xlane.f32.xlu1 %v620_v22  ;;  %615 = vadd.xlane.f32.xlu0 %v614_v23  ;;  %v641_v48 = vsel %vm610_vm0, %v604_v42, 0.0  ;;  %v650_v52 = vsel %vm610_vm0, %v607_v47, 0.0  ;;  %v647_v54 = vsel %vm610_vm0, %v606_v49, 0.0  ;;  %v608_v55 = vmul.f32 %v2699_v3, %v585_v51 }
  0x1e   : > { %v656_v56 = vsel %vm610_vm0, %v609_v53, 0.0 }
  0x1f   : > { %v653_v57 = vsel %vm610_vm0, %v608_v55, 0.0 }
  0x21   : > { %627 = vadd.xlane.f32.xlu1 %v626_v27  ;;  %624 = vadd.xlane.f32.xlu0 %v623_v29 }
  0x25   : > { %633 = vadd.xlane.f32.xlu1 %v632_v33  ;;  %630 = vadd.xlane.f32.xlu0 %v629_v35  ;;  %v682_v35 = vld [vmem:[%s555_s26] sm:$0x3] }
  0x26   : > { %v2790_v36 = vrot.slane %v682_v35, %v767_v4  ;;  %v2794_v37 = vrot.slane %v682_v35, %v771_v5 }
  0x29   : > { %639 = vadd.xlane.f32.xlu1 %v638_v39  ;;  %636 = vadd.xlane.f32.xlu0 %v635_v41 }
  0x2d   : > { %645 = vadd.xlane.f32.xlu1 %v644_v46  ;;  %642 = vadd.xlane.f32.xlu0 %v641_v48 }
  0x31   : > { %651 = vadd.xlane.f32.xlu1 %v650_v52  ;;  %648 = vadd.xlane.f32.xlu0 %v647_v54 }
  0x35   : > { %657 = vadd.xlane.f32.xlu1 %v656_v56  ;;  %654 = vadd.xlane.f32.xlu0 %v653_v57 }
  0xa6   : > { %v619_v59 = vpop.xlane.xlu1 %618  ;;  %v613_v60 = vpop.xlane.xlu0 %612 }
  0xa7   : > { %v666_v61 = vadd.f32 %v2205_v58, %v613_v60  ;;  %v668_v1 = vadd.f32 %v2205_v58, %v619_v59 }
  0xa9   : > { %686 = vperm.xlu0 %2353, %v666_v61  }
  0xaa   : > { %v622_v62 = vpop.xlane.xlu1 %621  ;;  %v616_v63 = vpop.xlane.xlu0 %615 }
  0xab   : > { %v667_v0 = vadd.f32 %v2205_v58, %v616_v63  ;;  %v669_v3 = vadd.f32 %v2205_v58, %v622_v62 }
  0xad   : > { %691 = vperm.xlu1 %2354, %v667_v0  }
  0xae   : > { %v628_v6 = vpop.xlane.xlu1 %627  ;;  %v625_v12 = vpop.xlane.xlu0 %624 }
  0xaf   : > { %v670_v13 = vadd.f32 %v2205_v58, %v625_v12  ;;  %v671_v18 = vadd.f32 %v2205_v58, %v628_v6 }
  0xb1   : > { %696 = vperm.xlu1 %2354, %v668_v1  }
  0xb2   : > { %v634_v7 = vpop.xlane.xlu1 %633  ;;  %v631_v17 = vpop.xlane.xlu0 %630 }
  0xb3   : > { %v672_v22 = vadd.f32 %v2205_v58, %v631_v17  ;;  %v673_v25 = vadd.f32 %v2205_v58, %v634_v7 }
  0xb5   : > { %701 = vperm.xlu1 %2354, %v669_v3  }
  0xb6   : > { %v640_v14 = vpop.xlane.xlu1 %639  ;;  %v637_v21 = vpop.xlane.xlu0 %636 }
  0xb7   : > { %v675_v16 = vadd.f32 %v2205_v58, %v640_v14  ;;  %v674_v29 = vadd.f32 %v2205_v58, %v637_v21 }
  0xb9   : > { %731 = vperm.xlu0 %2353, %v675_v16   ;;  %706 = vperm.xlu1 %2354, %v670_v13  }
  0xba   : > { %v646_v19 = vpop.xlane.xlu1 %645  ;;  %v643_v27 = vpop.xlane.xlu0 %642 }
  0xbb   : > { %v677_v20 = vadd.f32 %v2205_v58, %v646_v19  ;;  %v676_v31 = vadd.f32 %v2205_v58, %v643_v27 }
  0xbd   : > { %741 = vperm.xlu0 %2353, %v677_v20   ;;  %711 = vperm.xlu1 %2354, %v671_v18  }
  0xbe   : > { %v652_v23 = vpop.xlane.xlu1 %651  ;;  %v649_v30 = vpop.xlane.xlu0 %648 }
  0xbf   : > { %v679_v24 = vadd.f32 %v2205_v58, %v652_v23  ;;  %v678_v32 = vadd.f32 %v2205_v58, %v649_v30 }
  0xc1   : > { %751 = vperm.xlu0 %2353, %v679_v24   ;;  %716 = vperm.xlu1 %2354, %v672_v22  }
  0xc2   : > { %v658_v26 = vpop.xlane.xlu1 %657  ;;  %v655_v33 = vpop.xlane.xlu0 %654 }
  0xc3   : > { %v681_v28 = vadd.f32 %v2205_v58, %v658_v26  ;;  %v680_v34 = vadd.f32 %v2205_v58, %v655_v33 }
  0xc5   : > { %761 = vperm.xlu0 %2353, %v681_v28   ;;  %721 = vperm.xlu1 %2354, %v673_v25  }
  0xc9   : > { %726 = vperm.xlu1 %2354, %v674_v29  }
  0xcd   : > { %736 = vperm.xlu1 %2354, %v676_v31  }
  0xd1   : > { %746 = vperm.xlu1 %2354, %v678_v32  }
  0xd5   : > { %756 = vperm.xlu1 %2354, %v680_v34  }
 0x128   : > { %v687_v38 = vpop.permute.xlu0 %686 }
 0x129   : > { %v2797_v39 = vmul.f32 %v2790_v36, %v687_v38  ;;  %v2800_v40 = vmul.f32 %v2794_v37, %v687_v38 }
 0x12b   : > { %v807_v41 = vmax.f32 %v2797_v39, %v2800_v40 }
 0x12c   : > { %v692_v42 = vpop.permute.xlu1 %691 }
 0x12d   : > { %808 = vmax.xlane.f32.xlu1 %v807_v41  ;;  %v2805_v43 = vmul.f32 %v2790_v36, %v692_v42  ;;  %v2808_v4 = vmul.f32 %v2794_v37, %v692_v42 }
 0x12f   : > { %v810_v2 = vmax.f32 %v2805_v43, %v2808_v4 }
 0x130   : > { %v697_v5 = vpop.permute.xlu1 %696 }
 0x131   : > { %811 = vmax.xlane.f32.xlu0 %v810_v2  ;;  %v2813_v44 = vmul.f32 %v2790_v36, %v697_v5  ;;  %v2816_v45 = vmul.f32 %v2794_v37, %v697_v5 }
 0x133   : > { %v813_v46 = vmax.f32 %v2813_v44, %v2816_v45 }
 0x134   : > { %v702_v47 = vpop.permute.xlu1 %701 }
 0x135   : > { %814 = vmax.xlane.f32.xlu0 %v813_v46  ;;  %v2821_v48 = vmul.f32 %v2790_v36, %v702_v47  ;;  %v2824_v49 = vmul.f32 %v2794_v37, %v702_v47 }
 0x137   : > { %v816_v50 = vmax.f32 %v2821_v48, %v2824_v49 }
 0x138   : > { %v707_v51 = vpop.permute.xlu1 %706  ;;  %v732_v58 = vpop.permute.xlu0 %731 }
 0x139   : > { %817 = vmax.xlane.f32.xlu1 %v816_v50  ;;  %v2829_v52 = vmul.f32 %v2790_v36, %v707_v51  ;;  %v2832_v53 = vmul.f32 %v2794_v37, %v707_v51  ;;  %v2861_v12 = vmul.f32 %v2790_v36, %v732_v58  ;;  %v2864_v13 = vmul.f32 %v2794_v37, %v732_v58 }
 0x13b   : > { %v819_v54 = vmax.f32 %v2829_v52, %v2832_v53  ;;  %v834_v20 = vmax.f32 %v2861_v12, %v2864_v13 }
 0x13c   : > { %v712_v55 = vpop.permute.xlu1 %711  ;;  %v742_v0 = vpop.permute.xlu0 %741 }
 0x13d   : > { %820 = vmax.xlane.f32.xlu0 %v819_v54  ;;  %v2837_v56 = vmul.f32 %v2790_v36, %v712_v55  ;;  %v2840_v57 = vmul.f32 %v2794_v37, %v712_v55  ;;  %v2877_v21 = vmul.f32 %v2790_v36, %v742_v0  ;;  %v2880_v22 = vmul.f32 %v2794_v37, %v742_v0 }
 0x13f   : > { %v822_v59 = vmax.f32 %v2837_v56, %v2840_v57  ;;  %v840_v27 = vmax.f32 %v2877_v21, %v2880_v22 }
 0x140   : > { %v717_v60 = vpop.permute.xlu1 %716  ;;  %v752_v18 = vpop.permute.xlu0 %751 }
 0x141   : > { %823 = vmax.xlane.f32.xlu1 %v822_v59  ;;  %v2845_v61 = vmul.f32 %v2790_v36, %v717_v60  ;;  %v2848_v62 = vmul.f32 %v2794_v37, %v717_v60  ;;  %v2893_v28 = vmul.f32 %v2790_v36, %v752_v18  ;;  %v2896_v29 = vmul.f32 %v2794_v37, %v752_v18 }
 0x143   : > { %v825_v63 = vmax.f32 %v2845_v61, %v2848_v62  ;;  %v846_v35 = vmax.f32 %v2893_v28, %v2896_v29 }
 0x144   : > { %v722_v1 = vpop.permute.xlu1 %721  ;;  %v762_v30 = vpop.permute.xlu0 %761 }
 0x145   : > { %826 = vmax.xlane.f32.xlu0 %v825_v63  ;;  %v2853_v6 = vmul.f32 %v2790_v36, %v722_v1  ;;  %v2856_v3 = vmul.f32 %v2794_v37, %v722_v1  ;;  %v2909_v38 = vmul.f32 %v2790_v36, %v762_v30  ;;  %v2912_v41 = vmul.f32 %v2794_v37, %v762_v30 }
 0x147   : > { %v828_v7 = vmax.f32 %v2853_v6, %v2856_v3  ;;  %v852_v47 = vmax.f32 %v2909_v38, %v2912_v41 }
 0x148   : > { %v727_v14 = vpop.permute.xlu1 %726 }
 0x149   : > { %829 = vmax.xlane.f32.xlu1 %v828_v7  ;;  %v2867_v16 = vmul.f32 %v2790_v36, %v727_v14  ;;  %v2870_v17 = vmul.f32 %v2794_v37, %v727_v14 }
 0x14b   : > { %v831_v19 = vmax.f32 %v2867_v16, %v2870_v17 }
 0x14c   : > { %v737_v23 = vpop.permute.xlu1 %736 }
 0x14d   : > { %832 = vmax.xlane.f32.xlu0 %v831_v19  ;;  %835 = vmax.xlane.f32.xlu1 %v834_v20  ;;  %v2883_v24 = vmul.f32 %v2790_v36, %v737_v23  ;;  %v2886_v25 = vmul.f32 %v2794_v37, %v737_v23 }
 0x14f   : > { %v837_v26 = vmax.f32 %v2883_v24, %v2886_v25 }
 0x150   : > { %v747_v31 = vpop.permute.xlu1 %746 }
 0x151   : > { %838 = vmax.xlane.f32.xlu0 %v837_v26  ;;  %841 = vmax.xlane.f32.xlu1 %v840_v27  ;;  %v2899_v32 = vmul.f32 %v2790_v36, %v747_v31  ;;  %v2902_v33 = vmul.f32 %v2794_v37, %v747_v31 }
 0x153   : > { %v843_v34 = vmax.f32 %v2899_v32, %v2902_v33 }
 0x154   : > { %v757_v42 = vpop.permute.xlu1 %756 }
 0x155   : > { %844 = vmax.xlane.f32.xlu0 %v843_v34  ;;  %847 = vmax.xlane.f32.xlu1 %v846_v35  ;;  %v2915_v2 = vmul.f32 %v2790_v36, %v757_v42  ;;  %v2918_v5 = vmul.f32 %v2794_v37, %v757_v42 }
 0x157   : > { %v849_v46 = vmax.f32 %v2915_v2, %v2918_v5 }
 0x159   : > { %850 = vmax.xlane.f32.xlu0 %v849_v46  ;;  %853 = vmax.xlane.f32.xlu1 %v852_v47 }
 0x1ba   : > { %v809_v50 = vpop.xlane.xlu1 %808 }
 0x1bb   : > { %v855_v51 = vsub.f32 %v2797_v39, %v809_v50  ;;  %v856_v54 = vsub.f32 %v2800_v40, %v809_v50 }
 0x1bd   : > { %v887_v55 = vmul.f32 1.442695, %v855_v51  ;;  %v889_v58 = vmul.f32 1.442695, %v856_v54 }
 0x1be   : > { %v812_v36 = vpop.xlane.xlu0 %811 }
 0x1bf   : > { %2363 = vpow2.f32 %v887_v55  ;;  %v857_v37 = vsub.f32 %v2805_v43, %v812_v36  ;;  %v858_v59 = vsub.f32 %v2808_v4, %v812_v36 }
 0x1c0   : > { %2365 = vpow2.f32 %v889_v58 }
 0x1c1   : > { %v891_v60 = vmul.f32 1.442695, %v857_v37  ;;  %v893_v63 = vmul.f32 1.442695, %v858_v59 }
 0x1c2   : > { %v815_v0 = vpop.xlane.xlu0 %814 }
 0x1c3   : > { %2367 = vpow2.f32 %v891_v60  ;;  %v859_v1 = vsub.f32 %v2813_v44, %v815_v0  ;;  %v860_v7 = vsub.f32 %v2816_v45, %v815_v0 }
 0x1c4   : > { %2369 = vpow2.f32 %v893_v63 }
 0x1c5   : > { %v895_v39 = vmul.f32 1.442695, %v859_v1  ;;  %v897_v40 = vmul.f32 1.442695, %v860_v7 }
 0x1c6   : > { %v818_v14 = vpop.xlane.xlu1 %817 }
 0x1c7   : > { %2371 = vpow2.f32 %v895_v39  ;;  %v861_v18 = vsub.f32 %v2821_v48, %v818_v14  ;;  %v862_v43 = vsub.f32 %v2824_v49, %v818_v14 }
 0x1c8   : > { %2373 = vpow2.f32 %v897_v40 }
 0x1c9   : > { %v2364_v4 = vpop.eup %2363  ;;  %v899_v19 = vmul.f32 1.442695, %v861_v18  ;;  %v901_v20 = vmul.f32 1.442695, %v862_v43 }
 0x1ca   : > { %v2366_v23 = vpop.eup %2365  ;;  %v821_v26 = vpop.xlane.xlu0 %820  ;;  %v1010_v27 = vmul.f32 %v2364_v4, %v2721_v8 }
 0x1cb   : > { %2375 = vpow2.f32 %v899_v19  ;;  %v863_v44 = vsub.f32 %v2829_v52, %v821_v26  ;;  %v864_v45 = vsub.f32 %v2832_v53, %v821_v26  ;;  %v951_v30 = vadd.f32 %v2366_v23, %v2364_v4 }
 0x1cc   : > { %2377 = vpow2.f32 %v901_v20  ;;  %v1011_v31 = vmul.f32 %v2366_v23, %v2725_v9 }
 0x1cd   : > { %v2368_v48 = vpop.eup %2367  ;;  %v903_v34 = vmul.f32 1.442695, %v863_v44  ;;  %v905_v49 = vmul.f32 1.442695, %v864_v45  ;;  %952 = vadd.xlane.f32.xlu0 %v951_v30 }
 0x1ce   : > { %v2370_v35 = vpop.eup %2369  ;;  %v824_v42 = vpop.xlane.xlu1 %823  ;;  %v1012_v46 = vmul.f32 %v2368_v48, %v2721_v8  ;;  %v2937_v47 = vadd.f32 %v1011_v31, %v1010_v27 }
 0x1cf   : > { %2379 = vpow2.f32 %v903_v34  ;;  %v865_v50 = vsub.f32 %v2837_v56, %v824_v42  ;;  %v866_v52 = vsub.f32 %v2840_v57, %v824_v42  ;;  %v954_v53 = vadd.f32 %v2370_v35, %v2368_v48 }
 0x1d0   : > { %2381 = vpow2.f32 %v905_v49  ;;  %v1013_v51 = vmul.f32 %v2370_v35, %v2725_v9 }
 0x1d1   : > { %v2372_v54 = vpop.eup %2371  ;;  %v907_v55 = vmul.f32 1.442695, %v865_v50  ;;  %v909_v58 = vmul.f32 1.442695, %v866_v52  ;;  %955 = vadd.xlane.f32.xlu1 %v954_v53 }
 0x1d2   : > { %v2374_v36 = vpop.eup %2373  ;;  %v827_v37 = vpop.xlane.xlu0 %826  ;;  %v2942_v59 = vadd.f32 %v1013_v51, %v1012_v46  ;;  %v1014_v60 = vmul.f32 %v2372_v54, %v2721_v8 }
 0x1d3   : > { %2383 = vpow2.f32 %v907_v55  ;;  %v867_v63 = vsub.f32 %v2845_v61, %v827_v37  ;;  %v868_v56 = vsub.f32 %v2848_v62, %v827_v37  ;;  %v957_v57 = vadd.f32 %v2374_v36, %v2372_v54 }
 0x1d4   : > { %2385 = vpow2.f32 %v909_v58  ;;  %v1015_v0 = vmul.f32 %v2374_v36, %v2725_v9 }
 0x1d5   : > { %v2376_v1 = vpop.eup %2375  ;;  %v911_v7 = vmul.f32 1.442695, %v867_v63  ;;  %v913_v39 = vmul.f32 1.442695, %v868_v56  ;;  %958 = vadd.xlane.f32.xlu0 %v957_v57 }
 0x1d6   : > { %v2378_v40 = vpop.eup %2377  ;;  %v830_v14 = vpop.xlane.xlu1 %829  ;;  %v1016_v18 = vmul.f32 %v2376_v1, %v2721_v8  ;;  %v2949_v43 = vadd.f32 %v1015_v0, %v1014_v60 }
 0x1d7   : > { %2387 = vpow2.f32 %v911_v7  ;;  %v869_v4 = vsub.f32 %v2853_v6, %v830_v14  ;;  %v870_v61 = vsub.f32 %v2856_v3, %v830_v14  ;;  %v960_v62 = vadd.f32 %v2378_v40, %v2376_v1 }
 0x1d8   : > { %2389 = vpow2.f32 %v913_v39  ;;  %v1017_v19 = vmul.f32 %v2378_v40, %v2725_v9 }
 0x1d9   : > { %v2380_v20 = vpop.eup %2379  ;;  %v915_v23 = vmul.f32 1.442695, %v869_v4  ;;  %v917_v26 = vmul.f32 1.442695, %v870_v61  ;;  %961 = vadd.xlane.f32.xlu1 %v960_v62 }
 0x1da   : > { %v2382_v27 = vpop.eup %2381  ;;  %v836_v44 = vpop.xlane.xlu1 %835  ;;  %v2954_v30 = vadd.f32 %v1017_v19, %v1016_v18  ;;  %v1018_v31 = vmul.f32 %v2380_v20, %v2721_v8 }
 0x1db   : > { %v833_v45 = vpop.xlane.xlu0 %832  ;;  %2391 = vpow2.f32 %v915_v23  ;;  %v873_v6 = vsub.f32 %v2861_v12, %v836_v44  ;;  %v874_v3 = vsub.f32 %v2864_v13, %v836_v44  ;;  %v963_v49 = vadd.f32 %v2382_v27, %v2380_v20 }
 0x1dc   : > { %v871_v48 = vsub.f32 %v2867_v16, %v833_v45  ;;  %2393 = vpow2.f32 %v917_v26  ;;  %v872_v34 = vsub.f32 %v2870_v17, %v833_v45  ;;  %v1019_v35 = vmul.f32 %v2382_v27, %v2725_v9 }
 0x1dd   : > { %v2384_v42 = vpop.eup %2383  ;;  %v923_v46 = vmul.f32 1.442695, %v873_v6  ;;  %v925_v50 = vmul.f32 1.442695, %v874_v3  ;;  %964 = vadd.xlane.f32.xlu0 %v963_v49 }
 0x1de   : > { %v919_v52 = vmul.f32 1.442695, %v871_v48  ;;  %v2386_v53 = vpop.eup %2385  ;;  %v921_v51 = vmul.f32 1.442695, %v872_v34  ;;  %v842_v54 = vpop.xlane.xlu1 %841  ;;  %v1020_v12 = vmul.f32 %v2384_v42, %v2721_v8  ;;  %v2963_v13 = vadd.f32 %v1019_v35, %v1018_v31 }
 0x1df   : > { %v839_v55 = vpop.xlane.xlu0 %838  ;;  %2395 = vpow2.f32 %v923_v46  ;;  %v877_v16 = vsub.f32 %v2877_v21, %v842_v54  ;;  %v878_v17 = vsub.f32 %v2880_v22, %v842_v54  ;;  %v966_v37 = vadd.f32 %v2386_v53, %v2384_v42 }
 0x1e0   : > { %v875_v58 = vsub.f32 %v2883_v24, %v839_v55  ;;  %2397 = vpow2.f32 %v925_v50  ;;  %v876_v36 = vsub.f32 %v2886_v25, %v839_v55  ;;  %v1021_v60 = vmul.f32 %v2386_v53, %v2725_v9 }
 0x1e1   : > { %v2388_v63 = vpop.eup %2387  ;;  %2399 = vpow2.f32 %v919_v52  ;;  %v931_v56 = vmul.f32 1.442695, %v877_v16  ;;  %v933_v57 = vmul.f32 1.442695, %v878_v17  ;;  %967 = vadd.xlane.f32.xlu1 %v966_v37 }
 0x1e2   : > { %v927_v0 = vmul.f32 1.442695, %v875_v58  ;;  %v2390_v1 = vpop.eup %2389  ;;  %2401 = vpow2.f32 %v921_v51  ;;  %v929_v7 = vmul.f32 1.442695, %v876_v36  ;;  %v848_v21 = vpop.xlane.xlu1 %847  ;;  %v2970_v22 = vadd.f32 %v1021_v60, %v1020_v12 }
 0x1e3   : > { %v845_v39 = vpop.xlane.xlu0 %844  ;;  %v1022_v24 = vmul.f32 %v2388_v63, %v2721_v8  ;;  %2403 = vpow2.f32 %v931_v56  ;;  %v881_v25 = vsub.f32 %v2893_v28, %v848_v21  ;;  %v882_v40 = vsub.f32 %v2896_v29, %v848_v21 }
 0x1e4   : > { %v879_v14 = vsub.f32 %v2899_v32, %v845_v39  ;;  %2405 = vpow2.f32 %v933_v57  ;;  %v880_v18 = vsub.f32 %v2902_v33, %v845_v39  ;;  %v969_v4 = vadd.f32 %v2390_v1, %v2388_v63 }
 0x1e5   : > { %v1023_v61 = vmul.f32 %v2390_v1, %v2725_v9  ;;  %v2392_v62 = vpop.eup %2391  ;;  %2407 = vpow2.f32 %v927_v0  ;;  %v939_v19 = vmul.f32 1.442695, %v881_v25  ;;  %v941_v20 = vmul.f32 1.442695, %v882_v40 }
 0x1e6   : > { %v935_v23 = vmul.f32 1.442695, %v879_v14  ;;  %v2394_v26 = vpop.eup %2393  ;;  %2409 = vpow2.f32 %v929_v7  ;;  %v937_v27 = vmul.f32 1.442695, %v880_v18  ;;  %970 = vadd.xlane.f32.xlu0 %v969_v4  ;;  %v854_v28 = vpop.xlane.xlu1 %853  ;;  %v1024_v29 = vmul.f32 %v2392_v62, %v2721_v8 }
 0x1e7   : > { %v851_v44 = vpop.xlane.xlu0 %850  ;;  %v2979_v32 = vadd.f32 %v1023_v61, %v1022_v24  ;;  %2411 = vpow2.f32 %v939_v19  ;;  %v885_v33 = vsub.f32 %v2909_v38, %v854_v28  ;;  %v886_v45 = vsub.f32 %v2912_v41, %v854_v28 }
 0x1e8   : > { %v883_v31 = vsub.f32 %v2915_v2, %v851_v44  ;;  %2413 = vpow2.f32 %v941_v20  ;;  %v884_v6 = vsub.f32 %v2918_v5, %v851_v44  ;;  %v972_v3 = vadd.f32 %v2394_v26, %v2392_v62 }
 0x1e9   : > { %v1025_v48 = vmul.f32 %v2394_v26, %v2725_v9  ;;  %v2396_v34 = vpop.eup %2395  ;;  %2415 = vpow2.f32 %v935_v23  ;;  %v947_v49 = vmul.f32 1.442695, %v885_v33  ;;  %v949_v35 = vmul.f32 1.442695, %v886_v45 }
 0x1ea   : > { %v943_v42 = vmul.f32 1.442695, %v883_v31  ;;  %v2398_v46 = vpop.eup %2397  ;;  %2417 = vpow2.f32 %v937_v27  ;;  %v945_v50 = vmul.f32 1.442695, %v884_v6  ;;  %973 = vadd.xlane.f32.xlu1 %v972_v3  ;;  %v1028_v41 = vmul.f32 %v2396_v34, %v2721_v8 }
 0x1eb   : > { %v2986_v38 = vadd.f32 %v1025_v48, %v1024_v29  ;;  %v2400_v2 = vpop.eup %2399  ;;  %2419 = vpow2.f32 %v947_v49  ;;  %v978_v52 = vadd.f32 %v2398_v46, %v2396_v34  ;;  %v1029_v5 = vmul.f32 %v2398_v46, %v2725_v9 }
 0x1ec   : > { %v2402_v53 = vpop.eup %2401  ;;  %2421 = vpow2.f32 %v949_v35  ;;  %v1026_v51 = vmul.f32 %v2400_v2, %v2721_v8 }
 0x1ed   : > { %v2404_v54 = vpop.eup %2403  ;;  %2423 = vpow2.f32 %v943_v42  ;;  %v975_v55 = vadd.f32 %v2402_v53, %v2400_v2  ;;  %v1069_v12 = vadd.f32 %v1029_v5, %v1028_v41  ;;  %v1027_v16 = vmul.f32 %v2402_v53, %v2725_v9 }
 0x1ee   : > { %v2406_v17 = vpop.eup %2405  ;;  %2425 = vpow2.f32 %v945_v50  ;;  %979 = vadd.xlane.f32.xlu1 %v978_v52  ;;  %v1032_v58 = vmul.f32 %v2404_v54, %v2721_v8  ;;  %v3021_v52 = vld [vmem:[%s3702_s5] ss:$0 sm:$0xff] }
 0x1ef   : > { %v2408_v36 = vpop.eup %2407  ;;  %976 = vadd.xlane.f32.xlu0 %v975_v55  ;;  %v984_v37 = vadd.f32 %v2406_v17, %v2404_v54  ;;  %v1066_v60 = vadd.f32 %v1027_v16, %v1026_v51  ;;  %v1033_v63 = vmul.f32 %v2406_v17, %v2725_v9 }
 0x1f0   : > { %v2410_v56 = vpop.eup %2409  ;;  %v1030_v57 = vmul.f32 %v2408_v36, %v2721_v8 }
 0x1f1   : > { %v2412_v0 = vpop.eup %2411  ;;  %v981_v1 = vadd.f32 %v2410_v56, %v2408_v36  ;;  %v1075_v7 = vadd.f32 %v1033_v63, %v1032_v58  ;;  %v1031_v21 = vmul.f32 %v2410_v56, %v2725_v9 }
 0x1f2   : > { %v2414_v39 = vpop.eup %2413  ;;  %985 = vadd.xlane.f32.xlu1 %v984_v37  ;;  %v1036_v24 = vmul.f32 %v2412_v0, %v2721_v8 }
 0x1f3   : > { %v2416_v25 = vpop.eup %2415  ;;  %982 = vadd.xlane.f32.xlu0 %v981_v1  ;;  %v990_v40 = vadd.f32 %v2414_v39, %v2412_v0  ;;  %v1072_v14 = vadd.f32 %v1031_v21, %v1030_v57  ;;  %v1037_v18 = vmul.f32 %v2414_v39, %v2725_v9 }
 0x1f4   : > { %v2418_v4 = vpop.eup %2417  ;;  %v1034_v61 = vmul.f32 %v2416_v25, %v2721_v8 }
 0x1f5   : > { %v2420_v62 = vpop.eup %2419  ;;  %v987_v19 = vadd.f32 %v2418_v4, %v2416_v25  ;;  %v1081_v20 = vadd.f32 %v1037_v18, %v1036_v24  ;;  %v1035_v23 = vmul.f32 %v2418_v4, %v2725_v9 }
 0x1f6   : > { %v2422_v26 = vpop.eup %2421  ;;  %991 = vadd.xlane.f32.xlu1 %v990_v40  ;;  %v1040_v27 = vmul.f32 %v2420_v62, %v2721_v8 }
 0x1f7   : > { %v2424_v28 = vpop.eup %2423  ;;  %988 = vadd.xlane.f32.xlu0 %v987_v19  ;;  %v996_v44 = vadd.f32 %v2422_v26, %v2420_v62  ;;  %v1078_v29 = vadd.f32 %v1035_v23, %v1034_v61  ;;  %v1041_v33 = vmul.f32 %v2422_v26, %v2725_v9 }
 0x1f8   : > { %v2426_v45 = vpop.eup %2425  ;;  %v1038_v31 = vmul.f32 %v2424_v28, %v2721_v8 }
 0x1f9   : > { %v993_v6 = vadd.f32 %v2426_v45, %v2424_v28  ;;  %v1087_v3 = vadd.f32 %v1041_v33, %v1040_v27  ;;  %v1039_v48 = vmul.f32 %v2426_v45, %v2725_v9  ;;  %v2523_v28 = vld [vmem:[%s2716_s29 + $0x10] sm:$0xff] }
 0x1fa   : > { %997 = vadd.xlane.f32.xlu1 %v996_v44 }
 0x1fb   : > { %994 = vadd.xlane.f32.xlu0 %v993_v6  ;;  %v1084_v34 = vadd.f32 %v1039_v48, %v1038_v31 }
 0x1fe   : > { %1046 = vadd.xlane.f32.xlu1 %v2942_v59 }
 0x1ff   : > { %1043 = vadd.xlane.f32.xlu0 %v2937_v47 }
 0x202   : > { %1052 = vadd.xlane.f32.xlu1 %v2954_v30 }
 0x203   : > { %1049 = vadd.xlane.f32.xlu0 %v2949_v43 }
 0x206   : > { %1058 = vadd.xlane.f32.xlu1 %v2970_v22 }
 0x207   : > { %1055 = vadd.xlane.f32.xlu0 %v2963_v13 }
 0x20a   : > { %1064 = vadd.xlane.f32.xlu1 %v2986_v38 }
 0x20b   : > { %1061 = vadd.xlane.f32.xlu0 %v2979_v32 }
 0x20e   : > { %1070 = vadd.xlane.f32.xlu1 %v1069_v12  ;;  %v3026_v12 = vld [vmem:[%s3703_s6] ss:$0 sm:$0xff] }
 0x20f   : > { %1067 = vadd.xlane.f32.xlu0 %v1066_v60 }
 0x212   : > { %1076 = vadd.xlane.f32.xlu1 %v1075_v7 }
 0x213   : > { %1073 = vadd.xlane.f32.xlu0 %v1072_v14 }
 0x216   : > { %1082 = vadd.xlane.f32.xlu1 %v1081_v20 }
 0x217   : > { %1079 = vadd.xlane.f32.xlu0 %v1078_v29 }
 0x21a   : > { %1088 = vadd.xlane.f32.xlu1 %v1087_v3 }
 0x21b   : > { %1085 = vadd.xlane.f32.xlu0 %v1084_v34 }
 0x25a   : > { %v953_v9 = vpop.xlane.xlu0 %952 }
 0x25e   : > { %v956_v8 = vpop.xlane.xlu1 %955 }
 0x25f   : > { %2427 = vrcp.f32 %v956_v8  ;;  %v2524_v8 = vld [vmem:[%s2716_s29 + $0x28] sm:$0xff] }
 0x260   : > { %2429 = vrcp.f32 %v953_v9 }
 0x262   : > { %v959_v59 = vpop.xlane.xlu0 %958 }
 0x266   : > { %v962_v47 = vpop.xlane.xlu1 %961 }
 0x267   : > { %2431 = vrcp.f32 %v962_v47 }
 0x268   : > { %2433 = vrcp.f32 %v959_v59 }
 0x269   : > { %v2428_v2 = vpop.eup %2427 }
 0x26a   : > { %v965_v30 = vpop.xlane.xlu0 %964  ;;  %v2430_v53 = vpop.eup %2429 }
 0x26e   : > { %v968_v43 = vpop.xlane.xlu1 %967 }
 0x26f   : > { %2435 = vrcp.f32 %v968_v43 }
 0x270   : > { %2437 = vrcp.f32 %v965_v30  ;;  %v2525_v30 = vld [vmem:[%s2716_s29 + $0x20] sm:$0xff] }
 0x271   : > { %v2432_v17 = vpop.eup %2431 }
 0x272   : > { %v2434_v37 = vpop.eup %2433 }
 0x273   : > { %v971_v13 = vpop.xlane.xlu0 %970 }
 0x277   : > { %v974_v22 = vpop.xlane.xlu1 %973 }
 0x278   : > { %2439 = vrcp.f32 %v974_v22 }
 0x279   : > { %2441 = vrcp.f32 %v971_v13  ;;  %v2436_v21 = vpop.eup %2435 }
 0x27a   : > { %v2438_v40 = vpop.eup %2437 }
 0x27b   : > { %v980_v49 = vpop.xlane.xlu1 %979 }
 0x27c   : > { %v977_v35 = vpop.xlane.xlu0 %976  ;;  %2443 = vrcp.f32 %v980_v49 }
 0x27d   : > { %2445 = vrcp.f32 %v977_v35 }
 0x27f   : > { %v986_v42 = vpop.xlane.xlu1 %985 }
 0x280   : > { %v983_v32 = vpop.xlane.xlu0 %982  ;;  %2447 = vrcp.f32 %v986_v42 }
 0x281   : > { %2449 = vrcp.f32 %v983_v32 }
 0x282   : > { %v2440_v23 = vpop.eup %2439 }
 0x283   : > { %v992_v46 = vpop.xlane.xlu1 %991  ;;  %v2442_v29 = vpop.eup %2441 }
 0x284   : > { %v3012_v50 = vpop.xlane.xlu0 %988  ;;  %2451 = vrcp.f32 %v992_v46 }
 0x285   : > { %2453 = vrcp.f32 %v3012_v50 }
 0x286   : > { %v2444_v47 = vpop.eup %2443 }
 0x287   : > { %v3014_v38 = vpop.xlane.xlu1 %997  ;;  %v2446_v13 = vpop.eup %2445 }
 0x288   : > { %v3016_v41 = vpop.xlane.xlu0 %994  ;;  %2455 = vrcp.f32 %v3014_v38 }
 0x289   : > { %2457 = vrcp.f32 %v3016_v41 }
 0x28b   : > { %v1047_v5 = vpop.xlane.xlu1 %1046 }
 0x28c   : > { %v1093_v51 = vmul.f32 %v2428_v2, %v1047_v5  ;;  %v1044_v54 = vpop.xlane.xlu0 %1043 }
 0x28d   : > { %v1091_v55 = vmul.f32 %v2430_v53, %v1044_v54  ;;  %v2526_v53 = vld [vmem:[%s2716_s29 + $0x38] sm:$0xff]  ;;  %v2448_v54 = vpop.eup %2447 }
 0x28e   : > { %v1130_v16 = vmul.f32 %v3021_v52, %v1093_v51 }
 0x28f   : > { %v1129_v58 = vmul.f32 %v3021_v52, %v1091_v55  ;;  %v1053_v36 = vpop.xlane.xlu1 %1052 }
 0x290   : > { %v1097_v60 = vmul.f32 %v2432_v17, %v1053_v36  ;;  %v1050_v63 = vpop.xlane.xlu0 %1049  ;;  %v1153_v56 = vadd.f32 %v3026_v12, %v1130_v16  ;;  %v2527_v16 = vld [vmem:[%s2716_s29 + $0x30] sm:$0xff] }
 0x291   : > { %v1095_v57 = vmul.f32 %v2434_v37, %v1050_v63  ;;  %v1152_v0 = vadd.f32 %v3026_v12, %v1129_v58  ;;  %v2450_v58 = vpop.eup %2449 }
 0x292   : > { %v1132_v1 = vmul.f32 %v3021_v52, %v1097_v60  ;;  %v3034_v7 = vadd.f32 %v1153_v56, %v2739_v15 }
 0x293   : > { %v1131_v39 = vmul.f32 %v3021_v52, %v1095_v57  ;;  %v1059_v24 = vpop.xlane.xlu1 %1058  ;;  %v3038_v25 = vadd.f32 %v1152_v0, %v2728_v10 }
 0x294   : > { %v1101_v14 = vmul.f32 %v2436_v21, %v1059_v24  ;;  %v1056_v18 = vpop.xlane.xlu0 %1055  ;;  %v1189_v4 = vsel %vm610_vm0, %v3034_v7, 0.0  ;;  %v1155_v61 = vadd.f32 %v3026_v12, %v1132_v1  ;;  %v2528_v1 = vld [vmem:[%s2716_s29 + $0x48] sm:$0xff] }
 0x295   : > { %v1099_v62 = vmul.f32 %v2438_v40, %v1056_v18  ;;  %1190 = vadd.xlane.f32.xlu1 %v1189_v4  ;;  %v1186_v15 = vsel %vm610_vm0, %v3038_v25, 0.0  ;;  %v1154_v19 = vadd.f32 %v3026_v12, %v1131_v39  ;;  %v2452_v39 = vpop.eup %2451 }
 0x296   : > { %v1134_v10 = vmul.f32 %v3021_v52, %v1101_v14  ;;  %1187 = vadd.xlane.f32.xlu0 %v1186_v15  ;;  %v3048_v20 = vadd.f32 %v1155_v61, %v2731_v11  ;;  %v2529_v14 = vld [vmem:[%s2716_s29 + $0x40] sm:$0xff]  ;;  %v2454_v4 = vpop.eup %2453 }
 0x297   : > { %v1133_v26 = vmul.f32 %v3021_v52, %v1099_v62  ;;  %v1065_v27 = vpop.xlane.xlu1 %1064  ;;  %v3052_v44 = vadd.f32 %v2523_v28, %v1154_v19  ;;  %v2530_v28 = vld [vmem:[%s2716_s29 + $0x58] sm:$0xff] }
 0x298   : > { %v1105_v33 = vmul.f32 %v2440_v23, %v1065_v27  ;;  %v1062_v45 = vpop.xlane.xlu0 %1061  ;;  %v1195_v31 = vsel %vm610_vm0, %v3048_v20, 0.0  ;;  %v1157_v6 = vadd.f32 %v3026_v12, %v1134_v10 }
 0x299   : > { %v1103_v11 = vmul.f32 %v2442_v29, %v1062_v45  ;;  %1196 = vadd.xlane.f32.xlu1 %v1195_v31  ;;  %v1192_v3 = vsel %vm610_vm0, %v3052_v44, 0.0  ;;  %v1156_v48 = vadd.f32 %v3026_v12, %v1133_v26 }
 0x29a   : > { %v1136_v34 = vmul.f32 %v3021_v52, %v1105_v33  ;;  %1193 = vadd.xlane.f32.xlu0 %v1192_v3  ;;  %v3063_v9 = vadd.f32 %v2524_v8, %v1157_v6  ;;  %v2456_v33 = vpop.eup %2455  ;;  %v2531_v6 = vld [vmem:[%s2716_s29 + $0x50] sm:$0xff] }
 0x29b   : > { %v1135_v59 = vmul.f32 %v3021_v52, %v1103_v11  ;;  %v1071_v43 = vpop.xlane.xlu1 %1070  ;;  %v3067_v22 = vadd.f32 %v2525_v30, %v1156_v48  ;;  %v2458_v3 = vpop.eup %2457 }
 0x29c   : > { %v1109_v49 = vmul.f32 %v2444_v47, %v1071_v43  ;;  %v1068_v35 = vpop.xlane.xlu0 %1067  ;;  %v1201_v42 = vsel %vm610_vm0, %v3063_v9, 0.0  ;;  %v1159_v32 = vadd.f32 %v3026_v12, %v1136_v34 }
 0x29d   : > { %v1107_v46 = vmul.f32 %v2446_v13, %v1068_v35  ;;  %1202 = vadd.xlane.f32.xlu1 %v1201_v42  ;;  %v1198_v50 = vsel %vm610_vm0, %v3067_v22, 0.0  ;;  %v1158_v2 = vadd.f32 %v3026_v12, %v1135_v59 }
 0x29e   : > { %v1138_v5 = vmul.f32 %v3021_v52, %v1109_v49  ;;  %1199 = vadd.xlane.f32.xlu0 %v1198_v50  ;;  %v3079_v51 = vadd.f32 %v2526_v53, %v1159_v32  ;;  %v2532_v49 = vld [vmem:[%s2716_s29 + $0x68] sm:$0xff]  ;;  %v2533_v32 = vld [vmem:[%s2716_s29 + $0x60] sm:$0xff] }
 0x29f   : > { %v1137_v55 = vmul.f32 %v3021_v52, %v1107_v46  ;;  %v1077_v38 = vpop.xlane.xlu1 %1076  ;;  %v3083_v17 = vadd.f32 %v2527_v16, %v1158_v2 }
 0x2a0   : > { %v1113_v36 = vmul.f32 %v2448_v54, %v1077_v38  ;;  %v1074_v37 = vpop.xlane.xlu0 %1073  ;;  %v1207_v41 = vsel %vm610_vm0, %v3079_v51, 0.0  ;;  %v1161_v60 = vadd.f32 %v3026_v12, %v1138_v5  ;;  %v2534_v54 = vld [vmem:[%s2716_s29 + $0x78] sm:$0xff]  ;;  %v2535_v38 = vld [vmem:[%s2716_s29 + $0x70] sm:$0xff] }
 0x2a1   : > { %v1111_v63 = vmul.f32 %v2450_v58, %v1074_v37  ;;  %1208 = vadd.xlane.f32.xlu1 %v1207_v41  ;;  %v1204_v56 = vsel %vm610_vm0, %v3083_v17, 0.0  ;;  %v1160_v57 = vadd.f32 %v3026_v12, %v1137_v55 }
 0x2a2   : > { %v1140_v0 = vmul.f32 %v3021_v52, %v1113_v36  ;;  %1205 = vadd.xlane.f32.xlu0 %v1204_v56  ;;  %v3093_v21 = vadd.f32 %v2528_v1, %v1161_v60 }
 0x2a3   : > { %v1139_v24 = vmul.f32 %v3021_v52, %v1111_v63  ;;  %v1083_v40 = vpop.xlane.xlu1 %1082  ;;  %v3097_v18 = vadd.f32 %v2529_v14, %v1160_v57 }
 0x2a4   : > { %v1117_v61 = vmul.f32 %v2452_v39, %v1083_v40  ;;  %v1080_v62 = vpop.xlane.xlu0 %1079  ;;  %v1213_v15 = vsel %vm610_vm0, %v3093_v21, 0.0  ;;  %v1163_v19 = vadd.f32 %v3026_v12, %v1140_v0 }
 0x2a5   : > { %v1115_v10 = vmul.f32 %v2454_v4, %v1080_v62  ;;  %1214 = vadd.xlane.f32.xlu1 %v1213_v15  ;;  %v1210_v23 = vsel %vm610_vm0, %v3097_v18, 0.0  ;;  %v1162_v26 = vadd.f32 %v3026_v12, %v1139_v24 }
 0x2a6   : > { %v1142_v27 = vmul.f32 %v3021_v52, %v1117_v61  ;;  %1211 = vadd.xlane.f32.xlu0 %v1210_v23  ;;  %v3107_v29 = vadd.f32 %v2530_v28, %v1163_v19 }
 0x2a7   : > { %v1141_v45 = vmul.f32 %v3021_v52, %v1115_v10  ;;  %v1089_v31 = vpop.xlane.xlu1 %1088  ;;  %v3111_v11 = vadd.f32 %v2531_v6, %v1162_v26 }
 0x2a8   : > { %v1165_v48 = vadd.f32 %v3026_v12, %v1142_v27  ;;  %v1121_v34 = vmul.f32 %v2456_v33, %v1089_v31  ;;  %v1086_v8 = vpop.xlane.xlu0 %1085  ;;  %v1219_v47 = vsel %vm610_vm0, %v3107_v29, 0.0 }
 0x2a9   : > { %v1119_v59 = vmul.f32 %v2458_v3, %v1086_v8  ;;  %1220 = vadd.xlane.f32.xlu1 %v1219_v47  ;;  %v1216_v43 = vsel %vm610_vm0, %v3111_v11, 0.0  ;;  %v1164_v30 = vadd.f32 %v3026_v12, %v1141_v45 }
 0x2aa   : > { %v1144_v13 = vmul.f32 %v3021_v52, %v1121_v34  ;;  %1217 = vadd.xlane.f32.xlu0 %v1216_v43  ;;  %v3121_v35 = vadd.f32 %v2532_v49, %v1165_v48 }
 0x2ab   : > { %v1143_v42 = vmul.f32 %v3021_v52, %v1119_v59  ;;  %v3125_v46 = vadd.f32 %v2533_v32, %v1164_v30 }
 0x2ac   : > { %v1167_v50 = vadd.f32 %v3026_v12, %v1144_v13  ;;  %v1225_v2 = vsel %vm610_vm0, %v3121_v35, 0.0 }
 0x2ad   : > { %1226 = vadd.xlane.f32.xlu1 %v1225_v2  ;;  %v1222_v5 = vsel %vm610_vm0, %v3125_v46, 0.0  ;;  %v1166_v53 = vadd.f32 %v3026_v12, %v1143_v42 }
 0x2ae   : > { %1223 = vadd.xlane.f32.xlu0 %v1222_v5  ;;  %v3134_v55 = vadd.f32 %v2534_v54, %v1167_v50 }
 0x2af   : > { %v3137_v52 = vadd.f32 %v2535_v38, %v1166_v53 }
 0x2b0   : > { %v1231_v16 = vsel %vm610_vm0, %v3134_v55, 0.0 }
 0x2b1   : > { %1232 = vadd.xlane.f32.xlu1 %v1231_v16  ;;  %v1228_v58 = vsel %vm610_vm0, %v3137_v52, 0.0 }
 0x2b2   : > { %1229 = vadd.xlane.f32.xlu0 %v1228_v58 }
 0x322   : > { %v1191_v36 = vpop.xlane.xlu1 %1190 }
 0x323   : > { %v1236_v37 = vmul.f32 0.015625, %v1191_v36  ;;  %v1188_v41 = vpop.xlane.xlu0 %1187 }
 0x324   : > { %v1235_v60 = vmul.f32 0.015625, %v1188_v41 }
 0x325   : > { %v3144_v12 = vsub.f32 %v3034_v7, %v1236_v37 }
 0x326   : > { %v3147_v63 = vsub.f32 %v3038_v25, %v1235_v60  ;;  %v1197_v56 = vpop.xlane.xlu1 %1196 }
 0x327   : > { %v1238_v57 = vmul.f32 0.015625, %v1197_v56  ;;  %v1194_v0 = vpop.xlane.xlu0 %1193  ;;  %v1268_v1 = vmul.f32 %v3144_v12, %v3144_v12 }
 0x328   : > { %v1237_v39 = vmul.f32 0.015625, %v1194_v0  ;;  %v1267_v24 = vmul.f32 %v3147_v63, %v3147_v63 }
 0x329   : > { %v3154_v40 = vsub.f32 %v3048_v20, %v1238_v57  ;;  %v1286_v14 = vsel %vm610_vm0, %v1268_v1, 0.0 }
 0x32a   : > { %v3158_v7 = vsub.f32 %v3052_v44, %v1237_v39  ;;  %1287 = vadd.xlane.f32.xlu1 %v1286_v14  ;;  %v1203_v25 = vpop.xlane.xlu1 %1202  ;;  %v1283_v4 = vsel %vm610_vm0, %v1267_v24, 0.0 }
 0x32b   : > { %v1240_v61 = vmul.f32 0.015625, %v1203_v25  ;;  %1284 = vadd.xlane.f32.xlu0 %v1283_v4  ;;  %v1200_v62 = vpop.xlane.xlu0 %1199  ;;  %v1270_v15 = vmul.f32 %v3154_v40, %v3154_v40 }
 0x32c   : > { %v1239_v19 = vmul.f32 0.015625, %v1200_v62  ;;  %v1269_v20 = vmul.f32 %v3158_v7, %v3158_v7  ;;  %v2355_v62 = vld [vmem:[%s3706_s9] sm:$0xff]  }
 0x32d   : > { %v3166_v10 = vsub.f32 %v3063_v9, %v1240_v61  ;;  %v1292_v44 = vsel %vm610_vm0, %v1270_v15, 0.0  ;;  %2264 = vmatprep.subr.bf16.mxu0 %v2355_v62 }
 0x32e   : > { %v3170_v23 = vsub.f32 %v3067_v22, %v1239_v19  ;;  %1293 = vadd.xlane.f32.xlu1 %v1292_v44  ;;  %v1209_v26 = vpop.xlane.xlu1 %1208  ;;  %v1289_v27 = vsel %vm610_vm0, %v1269_v20, 0.0  ;;  %2265 = vmatpush3.bf16.msra.mxu0 %v2355_v62  ;;  %v2356_v20 = vld [vmem:[%s3706_s9 + $0x8] sm:$0xff]   ;;  %v2357_v44 = vld [vmem:[%s3706_s9 + $0x10] sm:$0xff]  }
 0x32f   : > { %v1242_v28 = vmul.f32 0.015625, %v1209_v26  ;;  %1290 = vadd.xlane.f32.xlu0 %v1289_v27  ;;  %v1206_v33 = vpop.xlane.xlu0 %1205  ;;  %v1272_v45 = vmul.f32 %v3166_v10, %v3166_v10  ;;  %2266 = vmatprep.subr.bf16.mxu0 %v2356_v20  ;;  %v2358_v26 = vld [vmem:[%s3706_s9 + $0x18] sm:$0xff]   ;;  %v2359_v27 = vld [vmem:[%s3708_s11] sm:$0xff]  }
 0x330   : > { %v1241_v31 = vmul.f32 0.015625, %v1206_v33  ;;  %v1271_v9 = vmul.f32 %v3170_v23, %v3170_v23  ;;  %2288 = vmatprep.subr.bf16.mxu1 %v2359_v27 }
 0x331   : > { %v3178_v6 = vsub.f32 %v3079_v51, %v1242_v28  ;;  %v1298_v22 = vsel %vm610_vm0, %v1272_v45, 0.0  ;;  %v2360_v28 = vld [vmem:[%s3708_s11 + $0x8] sm:$0xff]   ;;  %2289 = vmatpush3.bf16.msra.mxu1 %v2359_v27 }
 0x332   : > { %v3182_v3 = vsub.f32 %v3083_v17, %v1241_v31  ;;  %1299 = vadd.xlane.f32.xlu1 %v1298_v22  ;;  %v1215_v48 = vpop.xlane.xlu1 %1214  ;;  %v1295_v34 = vsel %vm610_vm0, %v1271_v9, 0.0  ;;  %2267 = vmatpush3.bf16.msra.mxu0 %v2356_v20 }
 0x333   : > { %v1244_v8 = vmul.f32 0.015625, %v1215_v48  ;;  %1296 = vadd.xlane.f32.xlu0 %v1295_v34  ;;  %v1212_v47 = vpop.xlane.xlu0 %1211  ;;  %v1274_v59 = vmul.f32 %v3178_v6, %v3178_v6  ;;  %2268 = vmatprep.subr.bf16.mxu0 %v2357_v44 }
 0x334   : > { %v1243_v43 = vmul.f32 0.015625, %v1212_v47  ;;  %v1273_v51 = vmul.f32 %v3182_v3, %v3182_v3  ;;  %2290 = vmatprep.subr.bf16.mxu1 %v2360_v28 }
 0x335   : > { %v3190_v30 = vsub.f32 %v3093_v21, %v1244_v8  ;;  %v1304_v17 = vsel %vm610_vm0, %v1274_v59, 0.0  ;;  %2291 = vmatpush3.bf16.msra.mxu1 %v2360_v28 }
 0x336   : > { %v3194_v13 = vsub.f32 %v3097_v18, %v1243_v43  ;;  %1305 = vadd.xlane.f32.xlu1 %v1304_v17  ;;  %v1221_v49 = vpop.xlane.xlu1 %1220  ;;  %v1301_v42 = vsel %vm610_vm0, %v1273_v51, 0.0  ;;  %2269 = vmatpush3.bf16.msra.mxu0 %v2357_v44 }
 0x337   : > { %v1246_v32 = vmul.f32 0.015625, %v1221_v49  ;;  %1302 = vadd.xlane.f32.xlu0 %v1301_v42  ;;  %v1218_v50 = vpop.xlane.xlu0 %1217  ;;  %v1276_v2 = vmul.f32 %v3190_v30, %v3190_v30  ;;  %2270 = vmatprep.subr.bf16.mxu0 %v2358_v26 }
 0x338   : > { %v1245_v5 = vmul.f32 0.015625, %v1218_v50  ;;  %v1275_v21 = vmul.f32 %v3194_v13, %v3194_v13 }
 0x339   : > { %v3202_v53 = vsub.f32 %v3107_v29, %v1246_v32  ;;  %v1310_v18 = vsel %vm610_vm0, %v1276_v2, 0.0 }
 0x33a   : > { %v3206_v54 = vsub.f32 %v3111_v11, %v1245_v5  ;;  %1311 = vadd.xlane.f32.xlu1 %v1310_v18  ;;  %v1227_v38 = vpop.xlane.xlu1 %1226  ;;  %v1307_v16 = vsel %vm610_vm0, %v1275_v21, 0.0  ;;  %2271 = vmatpush3.bf16.msra.mxu0 %v2358_v26 }
 0x33b   : > { %v1248_v58 = vmul.f32 0.015625, %v1227_v38  ;;  %1308 = vadd.xlane.f32.xlu0 %v1307_v16  ;;  %v1224_v36 = vpop.xlane.xlu0 %1223  ;;  %v1278_v37 = vmul.f32 %v3202_v53, %v3202_v53 }
 0x33c   : > { %v1247_v41 = vmul.f32 0.015625, %v1224_v36  ;;  %v1277_v29 = vmul.f32 %v3206_v54, %v3206_v54  ;;  %v3260_v36 = vld [vmem:[%s3704_s7] ss:$0 sm:$0xff] }
 0x33d   : > { %v3214_v60 = vsub.f32 %v3121_v35, %v1248_v58  ;;  %v1316_v11 = vsel %vm610_vm0, %v1278_v37, 0.0 }
 0x33e   : > { %v3218_v56 = vsub.f32 %v3125_v46, %v1247_v41  ;;  %1317 = vadd.xlane.f32.xlu1 %v1316_v11  ;;  %v1233_v57 = vpop.xlane.xlu1 %1232  ;;  %v1313_v0 = vsel %vm610_vm0, %v1277_v29, 0.0 }
 0x33f   : > { %v1250_v1 = vmul.f32 0.015625, %v1233_v57  ;;  %1314 = vadd.xlane.f32.xlu0 %v1313_v0  ;;  %v1230_v39 = vpop.xlane.xlu0 %1229  ;;  %v1280_v24 = vmul.f32 %v3214_v60, %v3214_v60 }
 0x340   : > { %v1249_v14 = vmul.f32 0.015625, %v1230_v39  ;;  %v1279_v35 = vmul.f32 %v3218_v56, %v3218_v56 }
 0x341   : > { %v3226_v25 = vsub.f32 %v3134_v55, %v1250_v1  ;;  %v1322_v46 = vsel %vm610_vm0, %v1280_v24, 0.0  ;;  %v3266_v1 = vld [vmem:[%s3705_s8] ss:$0 sm:$0xff] }
 0x342   : > { %v3230_v4 = vsub.f32 %v3137_v52, %v1249_v14  ;;  %1323 = vadd.xlane.f32.xlu1 %v1322_v46  ;;  %v1319_v61 = vsel %vm610_vm0, %v1279_v35, 0.0 }
 0x343   : > { %1320 = vadd.xlane.f32.xlu0 %v1319_v61  ;;  %v1282_v15 = vmul.f32 %v3226_v25, %v3226_v25 }
 0x344   : > { %v1281_v55 = vmul.f32 %v3230_v4, %v3230_v4 }
 0x345   : > { %v1328_v19 = vsel %vm610_vm0, %v1282_v15, 0.0 }
 0x346   : > { %1329 = vadd.xlane.f32.xlu1 %v1328_v19  ;;  %v1325_v52 = vsel %vm610_vm0, %v1281_v55, 0.0 }
 0x347   : > { %1326 = vadd.xlane.f32.xlu0 %v1325_v52 }
 0x3b7   : > { %v1288_v33 = vpop.xlane.xlu1 %1287 }
 0x3b8   : > { %v1332_v45 = vmul.f32 0.015625, %v1288_v33  ;;  %v1285_v31 = vpop.xlane.xlu0 %1284 }
 0x3b9   : > { %v1331_v9 = vmul.f32 0.015625, %v1285_v31 }
 0x3ba   : > { %v1348_v22 = vadd.f32 1e-05, %v1332_v45 }
 0x3bb   : > { %v1347_v48 = vadd.f32 1e-05, %v1331_v9  ;;  %v1294_v34 = vpop.xlane.xlu1 %1293 }
 0x3bc   : > { %2459 = vrsqrt.f32 %v1348_v22  ;;  %v1334_v8 = vmul.f32 0.015625, %v1294_v34  ;;  %v1291_v47 = vpop.xlane.xlu0 %1290 }
 0x3bd   : > { %2461 = vrsqrt.f32 %v1347_v48  ;;  %v1333_v59 = vmul.f32 0.015625, %v1291_v47 }
 0x3be   : > { %v1350_v43 = vadd.f32 1e-05, %v1334_v8 }
 0x3bf   : > { %v1349_v51 = vadd.f32 1e-05, %v1333_v59  ;;  %v1300_v17 = vpop.xlane.xlu1 %1299 }
 0x3c0   : > { %2463 = vrsqrt.f32 %v1350_v43  ;;  %v1336_v49 = vmul.f32 0.015625, %v1300_v17  ;;  %v1297_v42 = vpop.xlane.xlu0 %1296 }
 0x3c1   : > { %2465 = vrsqrt.f32 %v1349_v51  ;;  %v1335_v32 = vmul.f32 0.015625, %v1297_v42 }
 0x3c2   : > { %v1352_v50 = vadd.f32 1e-05, %v1336_v49 }
 0x3c3   : > { %v1351_v2 = vadd.f32 1e-05, %v1335_v32  ;;  %v1306_v5 = vpop.xlane.xlu1 %1305 }
 0x3c4   : > { %2467 = vrsqrt.f32 %v1352_v50  ;;  %v1338_v21 = vmul.f32 0.015625, %v1306_v5  ;;  %v1303_v18 = vpop.xlane.xlu0 %1302 }
 0x3c5   : > { %2469 = vrsqrt.f32 %v1351_v2  ;;  %v1337_v38 = vmul.f32 0.015625, %v1303_v18 }
 0x3c6   : > { %v2460_v16 = vpop.eup %2459  ;;  %v1354_v58 = vadd.f32 1e-05, %v1338_v21 }
 0x3c7   : > { %v2462_v37 = vpop.eup %2461  ;;  %v1353_v41 = vadd.f32 1e-05, %v1337_v38  ;;  %v1312_v29 = vpop.xlane.xlu1 %1311  ;;  %v1380_v11 = vmul.f32 %v2460_v16, %v3144_v12 }
 0x3c8   : > { %2471 = vrsqrt.f32 %v1354_v58  ;;  %v1340_v57 = vmul.f32 0.015625, %v1312_v29  ;;  %v1309_v0 = vpop.xlane.xlu0 %1308  ;;  %v1379_v39 = vmul.f32 %v2462_v37, %v3147_v63 }
 0x3c9   : > { %2473 = vrsqrt.f32 %v1353_v41  ;;  %v1339_v24 = vmul.f32 0.015625, %v1309_v0  ;;  %v1402_v14 = vmul.f32 %v3260_v36, %v1380_v11 }
 0x3ca   : > { %v2464_v35 = vpop.eup %2463  ;;  %v1356_v46 = vadd.f32 1e-05, %v1340_v57  ;;  %v1401_v61 = vmul.f32 %v3260_v36, %v1379_v39 }
 0x3cb   : > { %v2466_v62 = vpop.eup %2465  ;;  %v1382_v12 = vmul.f32 %v2464_v35, %v3154_v40  ;;  %v1355_v15 = vadd.f32 1e-05, %v1339_v24  ;;  %v1318_v55 = vpop.xlane.xlu1 %1317  ;;  %v3273_v19 = vadd.f32 %v3266_v1, %v1402_v14 }
 0x3cc   : > { %v1381_v52 = vmul.f32 %v2466_v62, %v3158_v7  ;;  %2475 = vrsqrt.f32 %v1356_v46  ;;  %v1342_v63 = vmul.f32 0.015625, %v1318_v55  ;;  %v1315_v20 = vpop.xlane.xlu0 %1314  ;;  %v3277_v44 = vadd.f32 %v3266_v1, %v1401_v61 }
 0x3cd   : > { %2477 = vrsqrt.f32 %v1355_v15  ;;  %v1341_v26 = vmul.f32 0.015625, %v1315_v20  ;;  %v1404_v27 = vmul.f32 %v3260_v36, %v1382_v12 }
 0x3ce   : > { %v2468_v28 = vpop.eup %2467  ;;  %v1358_v33 = vadd.f32 1e-05, %v1342_v63  ;;  %v1439_v40 = vpack.c.bf16 %v3273_v19, %v3277_v44  ;;  %v1403_v45 = vmul.f32 %v3260_v36, %v1381_v52 }
 0x3cf   : > { %v2470_v31 = vpop.eup %2469  ;;  %v1384_v7 = vmul.f32 %v2468_v28, %v3166_v10  ;;  %v1357_v9 = vadd.f32 1e-05, %v1341_v26  ;;  %v1324_v22 = vpop.xlane.xlu1 %1323  ;;  %v3285_v48 = vadd.f32 %v3266_v1, %v1404_v27 }
 0x3d0   : > { %v1383_v34 = vmul.f32 %v2470_v31, %v3170_v23  ;;  %2479 = vrsqrt.f32 %v1358_v33  ;;  %v1344_v8 = vmul.f32 0.015625, %v1324_v22  ;;  %2272 = vmatprep.mubr.msk.bf16.mxu0 %vm610_vm0, %v1439_v40  ;;  %v1321_v47 = vpop.xlane.xlu0 %1320  ;;  %v3290_v59 = vadd.f32 %v3266_v1, %v1403_v45 }
 0x3d1   : > { %2481 = vrsqrt.f32 %v1357_v9  ;;  %v1343_v43 = vmul.f32 0.015625, %v1321_v47  ;;  %v1406_v51 = vmul.f32 %v3260_v36, %v1384_v7 }
 0x3d2   : > { %v2472_v10 = vpop.eup %2471  ;;  %v1360_v17 = vadd.f32 1e-05, %v1344_v8  ;;  %v1440_v49 = vpack.c.bf16 %v3285_v48, %v3290_v59  ;;  %v1405_v42 = vmul.f32 %v3260_v36, %v1383_v34 }
 0x3d3   : > { %v2474_v23 = vpop.eup %2473  ;;  %v1386_v32 = vmul.f32 %v2472_v10, %v3178_v6  ;;  %v1359_v50 = vadd.f32 1e-05, %v1343_v43  ;;  %v1330_v2 = vpop.xlane.xlu1 %1329  ;;  %v3298_v5 = vadd.f32 %v3266_v1, %v1406_v51  ;;  %v2361_v10 = vld [vmem:[%s3708_s11 + $0x10] sm:$0xff]  }
 0x3d4   : > { %v1385_v21 = vmul.f32 %v2474_v23, %v3182_v3  ;;  %2483 = vrsqrt.f32 %v1360_v17  ;;  %v1346_v18 = vmul.f32 0.015625, %v1330_v2  ;;  %2273 = vmatmul.mubr.msk.bf16.vlgmr.msra.gmra.mrb[0].mxu0 %vm610_vm0, %v1440_v49  ;;  %v1327_v38 = vpop.xlane.xlu0 %1326  ;;  %v3303_v16 = vadd.f32 %v3266_v1, %v1405_v42  ;;  %2292 = vmatprep.subr.bf16.mxu1 %v2361_v10 }
 0x3d5   : > { %2485 = vrsqrt.f32 %v1359_v50  ;;  %v1345_v58 = vmul.f32 0.015625, %v1327_v38  ;;  %v1408_v37 = vmul.f32 %v3260_v36, %v1386_v32  ;;  %2293 = vmatpush3.bf16.msra.mxu1 %v2361_v10 }
 0x3d6   : > { %v2476_v6 = vpop.eup %2475  ;;  %v1362_v41 = vadd.f32 1e-05, %v1346_v18  ;;  %v1441_v29 = vpack.c.bf16 %v3298_v5, %v3303_v16  ;;  %v1407_v11 = vmul.f32 %v3260_v36, %v1385_v21 }
 0x3d7   : > { %v2478_v3 = vpop.eup %2477  ;;  %v1388_v57 = vmul.f32 %v2476_v6, %v3190_v30  ;;  %v1361_v0 = vadd.f32 1e-05, %v1345_v58  ;;  %v3311_v39 = vadd.f32 %v3266_v1, %v1408_v37 }
 0x3d8   : > { %v1387_v24 = vmul.f32 %v2478_v3, %v3194_v13  ;;  %2487 = vrsqrt.f32 %v1362_v41  ;;  %2276 = vmatprep.mubr.msk.bf16.mxu0 %vm610_vm0, %v1441_v29  ;;  %v3316_v14 = vadd.f32 %v3266_v1, %v1407_v11 }
 0x3d9   : > { %2489 = vrsqrt.f32 %v1361_v0  ;;  %v1410_v35 = vmul.f32 %v3260_v36, %v1388_v57 }
 0x3da   : > { %v2480_v46 = vpop.eup %2479  ;;  %v1442_v61 = vpack.c.bf16 %v3311_v39, %v3316_v14  ;;  %v1409_v30 = vmul.f32 %v3260_v36, %v1387_v24 }
 0x3db   : > { %v2482_v62 = vpop.eup %2481  ;;  %v1390_v12 = vmul.f32 %v2480_v46, %v3202_v53  ;;  %v3324_v13 = vadd.f32 %v3266_v1, %v1410_v35 }
 0x3dc   : > { %v1389_v15 = vmul.f32 %v2482_v62, %v3206_v54  ;;  %2277 = vmatmul.mubr.msk.bf16.gmra.mrb[4].mxu0 %vm610_vm0, %v1442_v61  ;;  %v3329_v55 = vadd.f32 %v3266_v1, %v1409_v30 }
 0x3dd   : > { %v1412_v52 = vmul.f32 %v3260_v36, %v1390_v12 }
 0x3de   : > { %v2484_v63 = vpop.eup %2483  ;;  %v1443_v20 = vpack.c.bf16 %v3324_v13, %v3329_v55  ;;  %v1411_v26 = vmul.f32 %v3260_v36, %v1389_v15 }
 0x3df   : > { %v2486_v27 = vpop.eup %2485  ;;  %v1392_v53 = vmul.f32 %v2484_v63, %v3214_v60  ;;  %v3337_v28 = vadd.f32 %v3266_v1, %v1412_v52 }
 0x3e0   : > { %v1391_v54 = vmul.f32 %v2486_v27, %v3218_v56  ;;  %2280 = vmatprep.mubr.msk.bf16.mxu0 %vm610_vm0, %v1443_v20  ;;  %v3342_v33 = vadd.f32 %v3266_v1, %v1411_v26 }
 0x3e1   : > { %v1414_v40 = vmul.f32 %v3260_v36, %v1392_v53 }
 0x3e2   : > { %v2488_v45 = vpop.eup %2487  ;;  %v1444_v31 = vpack.c.bf16 %v3337_v28, %v3342_v33  ;;  %v1413_v7 = vmul.f32 %v3260_v36, %v1391_v54 }
 0x3e3   : > { %v2490_v9 = vpop.eup %2489  ;;  %v1394_v60 = vmul.f32 %v2488_v45, %v3226_v25  ;;  %v3350_v22 = vadd.f32 %v3266_v1, %v1414_v40 }
 0x3e4   : > { %v1393_v56 = vmul.f32 %v2490_v9, %v3230_v4  ;;  %2281 = vmatmul.mubr.msk.bf16.gmra.mrb[8].mxu0 %vm610_vm0, %v1444_v31  ;;  %v3355_v34 = vadd.f32 %v3266_v1, %v1413_v7 }
 0x3e5   : > { %v1416_v8 = vmul.f32 %v3260_v36, %v1394_v60 }
 0x3e6   : > { %v1445_v47 = vpack.c.bf16 %v3350_v22, %v3355_v34  ;;  %v1415_v43 = vmul.f32 %v3260_v36, %v1393_v56  ;;  %v2362_v36 = vld [vmem:[%s3708_s11 + $0x18] sm:$0xff]  }
 0x3e7   : > { %v3362_v51 = vadd.f32 %v3266_v1, %v1416_v8  ;;  %2294 = vmatprep.subr.bf16.mxu1 %v2362_v36 }
 0x3e8   : > { %2284 = vmatprep.mubr.msk.bf16.mxu0 %vm610_vm0, %v1445_v47  ;;  %v3366_v25 = vadd.f32 %v3266_v1, %v1415_v43  ;;  %2295 = vmatpush3.bf16.msra.mxu1 %v2362_v36  ;;  %v2210_v1 = vld [vmem:[%s3707_s10] ss:$0 sm:$0xff] }
 0x3ea   : > { %v1446_v4 = vpack.c.bf16 %v3362_v51, %v3366_v25 }
 0x3ec   : > { %2285 = vmatmul.mubr.msk.bf16.gmra.mrb[12].mxu0 %vm610_vm0, %v1446_v4 }
 0x4a7   : > { %v2274_v17 = vpop.f32.mrb[0].mxu0 }
 0x4a8   : > { %v1553_v49 = vadd.f32 %v2274_v17, %v2210_v1  ;;  %v1544_v42 = vpop.f32.mrb[1].mxu0 }
 0x4a9   : > { %v1545_v23 = vadd.f32 %v2210_v1, %v1544_v42  ;;  %v2275_v32 = vpop.f32.mrb[2].mxu0 }
 0x4aa   : > { %v1556_v50 = vadd.f32 %v2275_v32, %v2210_v1  ;;  %v1547_v2 = vpop.f32.mrb[3].mxu0  ;;  %v1609_v18 = vmax.f32 %v1553_v49, 0.0 }
 0x4ab   : > { %v1548_v21 = vadd.f32 %v2210_v1, %v1547_v2  ;;  %v1607_v58 = vmax.f32 %v1545_v23, 0.0 }
 0x4ac   : > { %v1610_v38 = vmax.f32 %v1556_v50, 0.0 }
 0x4ad   : > { %v1608_v37 = vmax.f32 %v1548_v21, 0.0 }
 0x4ae   : > { %v1624_v6 = vpack.c.bf16 %v1610_v38, %v1609_v18  ;;  %v3391_v38 = vld [vmem:[%s3709_s12] ss:$0 sm:$0xff] }
 0x4af   : > { %v2278_v41 = vpop.f32.mrb[4].mxu0  ;;  %v1623_v29 = vpack.c.bf16 %v1608_v37, %v1607_v58 }
 0x4b0   : > { %v1569_v11 = vadd.f32 %v2278_v41, %v2210_v1  ;;  %v1560_v3 = vpop.f32.mrb[5].mxu0 }
 0x4b1   : > { %v1561_v57 = vadd.f32 %v2210_v1, %v1560_v3  ;;  %v2279_v0 = vpop.f32.mrb[6].mxu0  ;;  %2296 = vmatprep.mubr.msk.bf16.mxu1 %vm610_vm0, %v1623_v29 }
 0x4b2   : > { %v1572_v24 = vadd.f32 %v2279_v0, %v2210_v1  ;;  %v1563_v35 = vpop.f32.mrb[7].mxu0  ;;  %2297 = vmatmul.mubr.msk.bf16.vlgmr.msra.gmra.mrb[0].mxu1 %vm610_vm0, %v1624_v6  ;;  %v1613_v61 = vmax.f32 %v1569_v11, 0.0 }
 0x4b3   : > { %v1564_v46 = vadd.f32 %v2210_v1, %v1563_v35  ;;  %v1611_v62 = vmax.f32 %v1561_v57, 0.0 }
 0x4b4   : > { %v1614_v30 = vmax.f32 %v1572_v24, 0.0 }
 0x4b5   : > { %v1612_v12 = vmax.f32 %v1564_v46, 0.0 }
 0x4b6   : > { %v1626_v15 = vpack.c.bf16 %v1614_v30, %v1613_v61 }
 0x4b7   : > { %v1625_v52 = vpack.c.bf16 %v1612_v12, %v1611_v62  ;;  %v2282_v63 = vpop.f32.mrb[8].mxu0 }
 0x4b8   : > { %v1585_v20 = vadd.f32 %v2282_v63, %v2210_v1  ;;  %v1576_v26 = vpop.f32.mrb[9].mxu0 }
 0x4b9   : > { %v1577_v27 = vadd.f32 %v2210_v1, %v1576_v26  ;;  %v2283_v53 = vpop.f32.mrb[10].mxu0  ;;  %2300 = vmatprep.mubr.msk.bf16.mxu1 %vm610_vm0, %v1625_v52 }
 0x4ba   : > { %v1588_v54 = vadd.f32 %v2283_v53, %v2210_v1  ;;  %v1579_v40 = vpop.f32.mrb[11].mxu0  ;;  %2301 = vmatmul.mubr.msk.bf16.gmra.mrb[4].mxu1 %vm610_vm0, %v1626_v15  ;;  %v1617_v31 = vmax.f32 %v1585_v20, 0.0 }
 0x4bb   : > { %v1580_v45 = vadd.f32 %v2210_v1, %v1579_v40  ;;  %v1615_v9 = vmax.f32 %v1577_v27, 0.0 }
 0x4bc   : > { %v1618_v7 = vmax.f32 %v1588_v54, 0.0 }
 0x4bd   : > { %v1616_v60 = vmax.f32 %v1580_v45, 0.0 }
 0x4be   : > { %v1628_v56 = vpack.c.bf16 %v1618_v7, %v1617_v31 }
 0x4bf   : > { %v1627_v8 = vpack.c.bf16 %v1616_v60, %v1615_v9  ;;  %v2286_v47 = vpop.f32.mrb[12].mxu0 }
 0x4c0   : > { %v1601_v43 = vadd.f32 %v2286_v47, %v2210_v1  ;;  %v1592_v4 = vpop.f32.mrb[13].mxu0 }
 0x4c1   : > { %v1593_v10 = vadd.f32 %v2210_v1, %v1592_v4  ;;  %v2287_v36 = vpop.f32.mrb[14].mxu0  ;;  %2304 = vmatprep.mubr.msk.bf16.mxu1 %vm610_vm0, %v1627_v8 }
 0x4c2   : > { %v1604_v17 = vadd.f32 %v2287_v36, %v2210_v1  ;;  %v1595_v49 = vpop.f32.mrb[15].mxu0  ;;  %2305 = vmatmul.mubr.msk.bf16.gmra.mrb[8].mxu1 %vm610_vm0, %v1628_v56  ;;  %v1621_v23 = vmax.f32 %v1601_v43, 0.0 }
 0x4c3   : > { %v1596_v42 = vadd.f32 %v2210_v1, %v1595_v49  ;;  %v1619_v50 = vmax.f32 %v1593_v10, 0.0 }
 0x4c4   : > { %v1622_v32 = vmax.f32 %v1604_v17, 0.0 }
 0x4c5   : > { %v1620_v2 = vmax.f32 %v1596_v42, 0.0 }
 0x4c6   : > { %v1630_v21 = vpack.c.bf16 %v1622_v32, %v1621_v23 }
 0x4c7   : > { %v1629_v18 = vpack.c.bf16 %v1620_v2, %v1619_v50 }
 0x4c9   : > { %2308 = vmatprep.mubr.msk.bf16.mxu1 %vm610_vm0, %v1629_v18 }
 0x4ca   : > { %2309 = vmatmul.mubr.msk.bf16.gmra.mrb[12].mxu1 %vm610_vm0, %v1630_v21 }
 0x585   : > { %v2298_v58 = vpop.f32.mrb[0].mxu1 }
 0x586   : > { %v1737_v37 = vadd.f32 %v2298_v58, %v3391_v38  ;;  %v1728_v6 = vpop.f32.mrb[1].mxu1 }
 0x587   : > { %v1729_v1 = vadd.f32 %v3391_v38, %v1728_v6  ;;  %v2299_v41 = vpop.f32.mrb[2].mxu1 }
 0x588   : > { %v3396_v29 = vadd.f32 %v1737_v37, %v3290_v59  ;;  %v1740_v11 = vadd.f32 %v2299_v41, %v3391_v38  ;;  %v1731_v3 = vpop.f32.mrb[3].mxu1 }
 0x589   : > { %v1732_v57 = vadd.f32 %v3391_v38, %v1731_v3  ;;  %v3401_v0 = vadd.f32 %v1729_v1, %v3277_v44 }
 0x58a   : > { %v3404_v24 = vadd.f32 %v1740_v11, %v3285_v48  ;;  %v1815_v35 = vsel %vm610_vm0, %v3396_v29, 0.0 }
 0x58b   : > { %1816 = vadd.xlane.f32.xlu0 %v1815_v35  ;;  %v3409_v46 = vadd.f32 %v1732_v57, %v3273_v19  ;;  %v1809_v44 = vsel %vm610_vm0, %v3401_v0, 0.0 }
 0x58c   : > { %v1818_v59 = vsel %vm610_vm0, %v3404_v24, 0.0 }
 0x58d   : > { %1819 = vadd.xlane.f32.xlu1 %v1818_v59  ;;  %v2302_v61 = vpop.f32.mrb[4].mxu1  ;;  %v1812_v63 = vsel %vm610_vm0, %v3409_v46, 0.0 }
 0x58e   : > { %v1753_v30 = vadd.f32 %v2302_v61, %v3391_v38  ;;  %v1744_v62 = vpop.f32.mrb[5].mxu1 }
 0x58f   : > { %v1745_v48 = vadd.f32 %v3391_v38, %v1744_v62  ;;  %1810 = vadd.xlane.f32.xlu0 %v1809_v44  ;;  %v2303_v12 = vpop.f32.mrb[6].mxu1 }
 0x590   : > { %v3418_v15 = vadd.f32 %v1753_v30, %v3316_v14  ;;  %v1756_v19 = vadd.f32 %v2303_v12, %v3391_v38  ;;  %v1747_v52 = vpop.f32.mrb[7].mxu1 }
 0x591   : > { %v1748_v20 = vadd.f32 %v3391_v38, %v1747_v52  ;;  %1813 = vadd.xlane.f32.xlu1 %v1812_v63  ;;  %v3425_v26 = vadd.f32 %v1745_v48, %v3303_v16 }
 0x592   : > { %v3428_v27 = vadd.f32 %v1756_v19, %v3311_v39  ;;  %v1827_v53 = vsel %vm610_vm0, %v3418_v15, 0.0 }
 0x593   : > { %1828 = vadd.xlane.f32.xlu0 %v1827_v53  ;;  %v3433_v14 = vadd.f32 %v1748_v20, %v3298_v5  ;;  %v1821_v16 = vsel %vm610_vm0, %v3425_v26, 0.0 }
 0x594   : > { %v1830_v54 = vsel %vm610_vm0, %v3428_v27, 0.0 }
 0x595   : > { %1831 = vadd.xlane.f32.xlu1 %v1830_v54  ;;  %v2306_v40 = vpop.f32.mrb[8].mxu1  ;;  %v1824_v56 = vsel %vm610_vm0, %v3433_v14, 0.0 }
 0x596   : > { %v1769_v45 = vadd.f32 %v2306_v40, %v3391_v38  ;;  %v1760_v31 = vpop.f32.mrb[9].mxu1 }
 0x597   : > { %v1761_v39 = vadd.f32 %v3391_v38, %v1760_v31  ;;  %1822 = vadd.xlane.f32.xlu0 %v1821_v16  ;;  %v2307_v7 = vpop.f32.mrb[10].mxu1 }
 0x598   : > { %v3442_v9 = vadd.f32 %v1769_v45, %v3342_v33  ;;  %v1772_v5 = vadd.f32 %v2307_v7, %v3391_v38  ;;  %v1763_v60 = vpop.f32.mrb[11].mxu1 }
 0x599   : > { %v1764_v8 = vadd.f32 %v3391_v38, %v1763_v60  ;;  %1825 = vadd.xlane.f32.xlu1 %v1824_v56  ;;  %v3449_v47 = vadd.f32 %v1761_v39, %v3329_v55 }
 0x59a   : > { %v3452_v43 = vadd.f32 %v1772_v5, %v3337_v28  ;;  %v1839_v4 = vsel %vm610_vm0, %v3442_v9, 0.0 }
 0x59b   : > { %1840 = vadd.xlane.f32.xlu0 %v1839_v4  ;;  %v3457_v33 = vadd.f32 %v1764_v8, %v3324_v13  ;;  %v1833_v55 = vsel %vm610_vm0, %v3449_v47, 0.0 }
 0x59c   : > { %v1842_v10 = vsel %vm610_vm0, %v3452_v43, 0.0 }
 0x59d   : > { %1843 = vadd.xlane.f32.xlu1 %v1842_v10  ;;  %v2310_v36 = vpop.f32.mrb[12].mxu1  ;;  %v1836_v13 = vsel %vm610_vm0, %v3457_v33, 0.0 }
 0x59e   : > { %v1776_v17 = vpop.f32.mrb[13].mxu1  ;;  %v1785_v49 = vadd.f32 %v2310_v36, %v3391_v38 }
 0x59f   : > { %v1777_v28 = vadd.f32 %v3391_v38, %v1776_v17  ;;  %1834 = vadd.xlane.f32.xlu0 %v1833_v55  ;;  %v2311_v42 = vpop.f32.mrb[14].mxu1 }
 0x5a0   : > { %v1779_v23 = vpop.f32.mrb[15].mxu1  ;;  %v1788_v50 = vadd.f32 %v2311_v42, %v3391_v38  ;;  %v3473_v21 = vadd.f32 %v1785_v49, %v3366_v25 }
 0x5a1   : > { %v3468_v32 = vadd.f32 %v1777_v28, %v3355_v34  ;;  %v1780_v2 = vadd.f32 %v3391_v38, %v1779_v23  ;;  %1837 = vadd.xlane.f32.xlu1 %v1836_v13 }
 0x5a2   : > { %v3481_v37 = vadd.f32 %v1788_v50, %v3362_v51  ;;  %v1851_v38 = vsel %vm610_vm0, %v3473_v21, 0.0 }
 0x5a3   : > { %v3476_v18 = vadd.f32 %v1780_v2, %v3350_v22  ;;  %v1845_v58 = vsel %vm610_vm0, %v3468_v32, 0.0 }
 0x5a4   : > { %1846 = vadd.xlane.f32.xlu0 %v1845_v58  ;;  %v1854_v25 = vsel %vm610_vm0, %v3481_v37, 0.0 }
 0x5a5   : > { %v1848_v34 = vsel %vm610_vm0, %v3476_v18, 0.0 }
 0x5a6   : > { %1849 = vadd.xlane.f32.xlu1 %v1848_v34 }
 0x5a8   : > { %1852 = vadd.xlane.f32.xlu0 %v1851_v38 }
 0x5aa   : > { %1855 = vadd.xlane.f32.xlu1 %v1854_v25 }
 0x618   : > { %v1817_v22 = vpop.xlane.xlu0 %1816 }
 0x619   : > { %v1859_v6 = vmul.f32 0.015625, %v1817_v22 }
 0x61a   : > { %v1820_v1 = vpop.xlane.xlu1 %1819 }
 0x61b   : > { %v3490_v41 = vsub.f32 %v3396_v29, %v1859_v6  ;;  %v1860_v51 = vmul.f32 0.015625, %v1820_v1 }
 0x61c   : > { %v1811_v11 = vpop.xlane.xlu0 %1810 }
 0x61d   : > { %v3493_v3 = vsub.f32 %v3404_v24, %v1860_v51  ;;  %v1857_v57 = vmul.f32 0.015625, %v1811_v11  ;;  %v1891_v35 = vmul.f32 %v3490_v41, %v3490_v41 }
 0x61e   : > { %v1814_v59 = vpop.xlane.xlu1 %1813 }
 0x61f   : > { %v3498_v61 = vsub.f32 %v3401_v0, %v1857_v57  ;;  %v1858_v30 = vmul.f32 0.015625, %v1814_v59  ;;  %v1911_v62 = vsel %vm610_vm0, %v1891_v35, 0.0  ;;  %v1892_v29 = vmul.f32 %v3493_v3, %v3493_v3 }
 0x620   : > { %1912 = vadd.xlane.f32.xlu0 %v1911_v62  ;;  %v1829_v44 = vpop.xlane.xlu0 %1828 }
 0x621   : > { %v3504_v48 = vsub.f32 %v3409_v46, %v1858_v30  ;;  %v1863_v24 = vmul.f32 0.015625, %v1829_v44  ;;  %v1914_v12 = vsel %vm610_vm0, %v1892_v29, 0.0  ;;  %v1889_v19 = vmul.f32 %v3498_v61, %v3498_v61 }
 0x622   : > { %v1832_v52 = vpop.xlane.xlu1 %1831  ;;  %1915 = vadd.xlane.f32.xlu1 %v1914_v12 }
 0x623   : > { %v3510_v0 = vsub.f32 %v3418_v15, %v1863_v24  ;;  %v1864_v63 = vmul.f32 0.015625, %v1832_v52  ;;  %v1905_v20 = vsel %vm610_vm0, %v1889_v19, 0.0  ;;  %v1890_v53 = vmul.f32 %v3504_v48, %v3504_v48 }
 0x624   : > { %1906 = vadd.xlane.f32.xlu0 %v1905_v20  ;;  %v1823_v46 = vpop.xlane.xlu0 %1822 }
 0x625   : > { %v3516_v54 = vsub.f32 %v3428_v27, %v1864_v63  ;;  %v1861_v40 = vmul.f32 0.015625, %v1823_v46  ;;  %v1908_v45 = vsel %vm610_vm0, %v1890_v53, 0.0  ;;  %v1895_v31 = vmul.f32 %v3510_v0, %v3510_v0 }
 0x626   : > { %v1826_v16 = vpop.xlane.xlu1 %1825  ;;  %1909 = vadd.xlane.f32.xlu1 %v1908_v45 }
 0x627   : > { %v3522_v15 = vsub.f32 %v3425_v26, %v1861_v40  ;;  %v1862_v39 = vmul.f32 0.015625, %v1826_v16  ;;  %v1923_v7 = vsel %vm610_vm0, %v1895_v31, 0.0  ;;  %v1896_v5 = vmul.f32 %v3516_v54, %v3516_v54 }
 0x628   : > { %1924 = vadd.xlane.f32.xlu0 %v1923_v7  ;;  %v1841_v27 = vpop.xlane.xlu0 %1840 }
 0x629   : > { %v3528_v60 = vsub.f32 %v3433_v14, %v1862_v39  ;;  %v1867_v56 = vmul.f32 0.015625, %v1841_v27  ;;  %v1926_v8 = vsel %vm610_vm0, %v1896_v5, 0.0  ;;  %v1893_v4 = vmul.f32 %v3522_v15, %v3522_v15 }
 0x62a   : > { %v1844_v10 = vpop.xlane.xlu1 %1843  ;;  %1927 = vadd.xlane.f32.xlu1 %v1926_v8 }
 0x62b   : > { %v3534_v26 = vsub.f32 %v3442_v9, %v1867_v56  ;;  %v1868_v36 = vmul.f32 0.015625, %v1844_v10  ;;  %v1917_v17 = vsel %vm610_vm0, %v1893_v4, 0.0  ;;  %v1894_v55 = vmul.f32 %v3528_v60, %v3528_v60 }
 0x62c   : > { %1918 = vadd.xlane.f32.xlu0 %v1917_v17  ;;  %v1835_v14 = vpop.xlane.xlu0 %1834 }
 0x62d   : > { %v3540_v49 = vsub.f32 %v3452_v43, %v1868_v36  ;;  %v1865_v28 = vmul.f32 0.015625, %v1835_v14  ;;  %v1920_v42 = vsel %vm610_vm0, %v1894_v55, 0.0  ;;  %v1899_v23 = vmul.f32 %v3534_v26, %v3534_v26 }
 0x62e   : > { %v1838_v13 = vpop.xlane.xlu1 %1837  ;;  %1921 = vadd.xlane.f32.xlu1 %v1920_v42 }
 0x62f   : > { %v3546_v9 = vsub.f32 %v3449_v47, %v1865_v28  ;;  %v1866_v50 = vmul.f32 0.015625, %v1838_v13  ;;  %v1935_v2 = vsel %vm610_vm0, %v1899_v23, 0.0  ;;  %v1900_v58 = vmul.f32 %v3540_v49, %v3540_v49  ;;  %v3588_v23 = vld [vmem:[%s3710_s13] ss:$0 sm:$0xff] }
 0x630   : > { %1936 = vadd.xlane.f32.xlu0 %v1935_v2 }
 0x631   : > { %v3552_v43 = vsub.f32 %v3457_v33, %v1866_v50  ;;  %v1847_v34 = vpop.xlane.xlu0 %1846  ;;  %v1938_v38 = vsel %vm610_vm0, %v1900_v58, 0.0  ;;  %v1897_v25 = vmul.f32 %v3546_v9, %v3546_v9 }
 0x632   : > { %v1869_v22 = vmul.f32 0.015625, %v1847_v34  ;;  %1939 = vadd.xlane.f32.xlu1 %v1938_v38  ;;  %v3594_v38 = vld [vmem:[%s3711_s14] ss:$0 sm:$0xff] }
 0x633   : > { %v1850_v47 = vpop.xlane.xlu1 %1849  ;;  %v1929_v6 = vsel %vm610_vm0, %v1897_v25, 0.0  ;;  %v1898_v1 = vmul.f32 %v3552_v43, %v3552_v43 }
 0x634   : > { %v3561_v51 = vsub.f32 %v3468_v32, %v1869_v22  ;;  %v1870_v11 = vmul.f32 0.015625, %v1850_v47  ;;  %1930 = vadd.xlane.f32.xlu0 %v1929_v6 }
 0x635   : > { %v1853_v33 = vpop.xlane.xlu0 %1852  ;;  %v1932_v57 = vsel %vm610_vm0, %v1898_v1, 0.0 }
 0x636   : > { %v3565_v35 = vsub.f32 %v3476_v18, %v1870_v11  ;;  %v1871_v59 = vmul.f32 0.015625, %v1853_v33  ;;  %1933 = vadd.xlane.f32.xlu1 %v1932_v57  ;;  %v1901_v30 = vmul.f32 %v3561_v51, %v3561_v51 }
 0x637   : > { %v1856_v62 = vpop.xlane.xlu1 %1855 }
 0x638   : > { %v3570_v29 = vsub.f32 %v3473_v21, %v1871_v59  ;;  %v1872_v44 = vmul.f32 0.015625, %v1856_v62  ;;  %v1941_v32 = vsel %vm610_vm0, %v1901_v30, 0.0  ;;  %v1902_v24 = vmul.f32 %v3565_v35, %v3565_v35 }
 0x639   : > { %1942 = vadd.xlane.f32.xlu0 %v1941_v32 }
 0x63a   : > { %v3576_v12 = vsub.f32 %v3481_v37, %v1872_v44  ;;  %v1944_v18 = vsel %vm610_vm0, %v1902_v24, 0.0  ;;  %v1903_v19 = vmul.f32 %v3570_v29, %v3570_v29 }
 0x63b   : > { %1945 = vadd.xlane.f32.xlu1 %v1944_v18 }
 0x63c   : > { %v1947_v52 = vsel %vm610_vm0, %v1903_v19, 0.0  ;;  %v1904_v21 = vmul.f32 %v3576_v12, %v3576_v12 }
 0x63d   : > { %1948 = vadd.xlane.f32.xlu0 %v1947_v52 }
 0x63e   : > { %v1950_v63 = vsel %vm610_vm0, %v1904_v21, 0.0 }
 0x63f   : > { %1951 = vadd.xlane.f32.xlu1 %v1950_v63 }
 0x6ad   : > { %v1913_v20 = vpop.xlane.xlu0 %1912 }
 0x6ae   : > { %v1955_v53 = vmul.f32 0.015625, %v1913_v20 }
 0x6af   : > { %v1916_v46 = vpop.xlane.xlu1 %1915 }
 0x6b0   : > { %v1971_v37 = vadd.f32 1e-05, %v1955_v53  ;;  %v1956_v40 = vmul.f32 0.015625, %v1916_v46 }
 0x6b1   : > { %v1907_v45 = vpop.xlane.xlu0 %1906 }
 0x6b2   : > { %2491 = vrsqrt.f32 %v1971_v37  ;;  %v1972_v31 = vadd.f32 1e-05, %v1956_v40  ;;  %v1953_v16 = vmul.f32 0.015625, %v1907_v45 }
 0x6b3   : > { %v1910_v39 = vpop.xlane.xlu1 %1909 }
 0x6b4   : > { %2493 = vrsqrt.f32 %v1972_v31  ;;  %v1969_v7 = vadd.f32 1e-05, %v1953_v16  ;;  %v1954_v5 = vmul.f32 0.015625, %v1910_v39 }
 0x6b5   : > { %v1925_v27 = vpop.xlane.xlu0 %1924 }
 0x6b6   : > { %2495 = vrsqrt.f32 %v1969_v7  ;;  %v1970_v56 = vadd.f32 1e-05, %v1954_v5  ;;  %v1959_v8 = vmul.f32 0.015625, %v1925_v27 }
 0x6b7   : > { %v1928_v4 = vpop.xlane.xlu1 %1927 }
 0x6b8   : > { %2497 = vrsqrt.f32 %v1970_v56  ;;  %v1975_v10 = vadd.f32 1e-05, %v1959_v8  ;;  %v1960_v36 = vmul.f32 0.015625, %v1928_v4 }
 0x6b9   : > { %v1919_v17 = vpop.xlane.xlu0 %1918 }
 0x6ba   : > { %2499 = vrsqrt.f32 %v1975_v10  ;;  %v1976_v55 = vadd.f32 1e-05, %v1960_v36  ;;  %v1957_v14 = vmul.f32 0.015625, %v1919_v17 }
 0x6bb   : > { %v1922_v28 = vpop.xlane.xlu1 %1921 }
 0x6bc   : > { %v2492_v42 = vpop.eup %2491  ;;  %2501 = vrsqrt.f32 %v1976_v55  ;;  %v1973_v13 = vadd.f32 1e-05, %v1957_v14  ;;  %v1958_v50 = vmul.f32 0.015625, %v1922_v28 }
 0x6bd   : > { %v2003_v2 = vmul.f32 %v2492_v42, %v3490_v41  ;;  %v1937_v58 = vpop.xlane.xlu0 %1936 }
 0x6be   : > { %v2494_v34 = vpop.eup %2493  ;;  %2503 = vrsqrt.f32 %v1973_v13  ;;  %v1974_v25 = vadd.f32 1e-05, %v1958_v50  ;;  %v1963_v22 = vmul.f32 0.015625, %v1937_v58 }
 0x6bf   : > { %v2025_v47 = vmul.f32 %v3588_v23, %v2003_v2  ;;  %v2004_v6 = vmul.f32 %v2494_v34, %v3493_v3  ;;  %v1940_v1 = vpop.xlane.xlu1 %1939 }
 0x6c0   : > { %v2496_v11 = vpop.eup %2495  ;;  %2505 = vrsqrt.f32 %v1974_v25  ;;  %v1979_v41 = vadd.f32 1e-05, %v1963_v22  ;;  %v1964_v33 = vmul.f32 0.015625, %v1940_v1 }
 0x6c1   : > { %v2047_v57 = vadd.f32 %v3594_v38, %v2025_v47  ;;  %v2026_v59 = vmul.f32 %v3588_v23, %v2004_v6  ;;  %v2001_v30 = vmul.f32 %v2496_v11, %v3498_v61  ;;  %v1931_v3 = vpop.xlane.xlu0 %1930 }
 0x6c2   : > { %v2498_v62 = vpop.eup %2497  ;;  %2507 = vrsqrt.f32 %v1979_v41  ;;  %v1980_v44 = vadd.f32 1e-05, %v1964_v33  ;;  %v1961_v32 = vmul.f32 0.015625, %v1931_v3 }
 0x6c3   : > { %2063 = vst.msk [vmem:[%s3603_s27 + $0x10] sm:$0xff] %vm610_vm0, %v2047_v57  ;;  %v2048_v24 = vadd.f32 %v3594_v38, %v2026_v59  ;;  %v2023_v18 = vmul.f32 %v3588_v23, %v2001_v30  ;;  %v2002_v19 = vmul.f32 %v2498_v62, %v3504_v48  ;;  %v1934_v52 = vpop.xlane.xlu1 %1933 }
 0x6c4   : > { %v2500_v21 = vpop.eup %2499  ;;  %2509 = vrsqrt.f32 %v1980_v44  ;;  %v1977_v63 = vadd.f32 1e-05, %v1961_v32  ;;  %v1962_v20 = vmul.f32 0.015625, %v1934_v52 }
 0x6c5   : > { %2064 = vst.msk [vmem:[%s3603_s27 + $0x18] sm:$0xff] %vm610_vm0, %v2048_v24  ;;  %v2045_v61 = vadd.f32 %v3594_v38, %v2023_v18  ;;  %v2024_v53 = vmul.f32 %v3588_v23, %v2002_v19  ;;  %v2007_v46 = vmul.f32 %v2500_v21, %v3510_v0 }
 0x6c6   : > { %v2502_v37 = vpop.eup %2501  ;;  %2511 = vrsqrt.f32 %v1977_v63  ;;  %v1978_v40 = vadd.f32 1e-05, %v1962_v20  ;;  %v1943_v45 = vpop.xlane.xlu0 %1942 }
 0x6c7   : > { %2061 = vst.msk [vmem:[%s3603_s27] sm:$0xff] %vm610_vm0, %v2045_v61  ;;  %v2046_v48 = vadd.f32 %v3594_v38, %v2024_v53  ;;  %v2029_v31 = vmul.f32 %v3588_v23, %v2007_v46  ;;  %v2008_v16 = vmul.f32 %v2502_v37, %v3516_v54  ;;  %v1965_v39 = vmul.f32 0.015625, %v1943_v45 }
 0x6c8   : > { %v2504_v7 = vpop.eup %2503  ;;  %2513 = vrsqrt.f32 %v1978_v40  ;;  %v1946_v5 = vpop.xlane.xlu1 %1945 }
 0x6c9   : > { %2062 = vst.msk [vmem:[%s3603_s27 + $0x8] sm:$0xff] %vm610_vm0, %v2046_v48  ;;  %v2051_v0 = vadd.f32 %v3594_v38, %v2029_v31  ;;  %v2030_v27 = vmul.f32 %v3588_v23, %v2008_v16  ;;  %v2005_v56 = vmul.f32 %v2504_v7, %v3522_v15  ;;  %v1981_v8 = vadd.f32 1e-05, %v1965_v39 }
 0x6ca   : > { %v2506_v4 = vpop.eup %2505  ;;  %v1966_v10 = vmul.f32 0.015625, %v1946_v5  ;;  %v1949_v36 = vpop.xlane.xlu0 %1948 }
 0x6cb   : > { %2067 = vst.msk [vmem:[%s3603_s27 + $0x30] sm:$0xff] %vm610_vm0, %v2051_v0  ;;  %v2052_v54 = vadd.f32 %v3594_v38, %v2030_v27  ;;  %v2027_v17 = vmul.f32 %v3588_v23, %v2005_v56  ;;  %v2006_v55 = vmul.f32 %v2506_v4, %v3528_v60  ;;  %2515 = vrsqrt.f32 %v1981_v8 }
 0x6cc   : > { %v2508_v14 = vpop.eup %2507  ;;  %v1982_v28 = vadd.f32 1e-05, %v1966_v10  ;;  %v1967_v42 = vmul.f32 0.015625, %v1949_v36  ;;  %v1952_v13 = vpop.xlane.xlu1 %1951 }
 0x6cd   : > { %2068 = vst.msk [vmem:[%s3603_s27 + $0x38] sm:$0xff] %vm610_vm0, %v2052_v54  ;;  %v2049_v15 = vadd.f32 %v3594_v38, %v2027_v17  ;;  %v2028_v50 = vmul.f32 %v3588_v23, %v2006_v55  ;;  %v2011_v2 = vmul.f32 %v2508_v14, %v3534_v26  ;;  %v1968_v58 = vmul.f32 0.015625, %v1952_v13 }
 0x6ce   : > { %v2510_v34 = vpop.eup %2509  ;;  %2517 = vrsqrt.f32 %v1982_v28  ;;  %v1983_v25 = vadd.f32 1e-05, %v1967_v42 }
 0x6cf   : > { %2065 = vst.msk [vmem:[%s3603_s27 + $0x20] sm:$0xff] %vm610_vm0, %v2049_v15  ;;  %v2050_v60 = vadd.f32 %v3594_v38, %v2028_v50  ;;  %v2033_v22 = vmul.f32 %v3588_v23, %v2011_v2  ;;  %v2012_v47 = vmul.f32 %v2510_v34, %v3540_v49  ;;  %v1984_v6 = vadd.f32 1e-05, %v1968_v58 }
 0x6d0   : > { %v2512_v1 = vpop.eup %2511  ;;  %2519 = vrsqrt.f32 %v1983_v25 }
 0x6d1   : > { %2066 = vst.msk [vmem:[%s3603_s27 + $0x28] sm:$0xff] %vm610_vm0, %v2050_v60  ;;  %v2055_v26 = vadd.f32 %v3594_v38, %v2033_v22  ;;  %v2034_v11 = vmul.f32 %v3588_v23, %v2012_v47  ;;  %v2009_v41 = vmul.f32 %v2512_v1, %v3546_v9  ;;  %2521 = vrsqrt.f32 %v1984_v6 }
 0x6d2   : > { %v2514_v33 = vpop.eup %2513 }
 0x6d3   : > { %2071 = vst.msk [vmem:[%s3603_s27 + $0x50] sm:$0xff] %vm610_vm0, %v2055_v26  ;;  %v2056_v57 = vadd.f32 %v3594_v38, %v2034_v11  ;;  %v2031_v49 = vmul.f32 %v3588_v23, %v2009_v41  ;;  %v2010_v59 = vmul.f32 %v2514_v33, %v3552_v43 }
 0x6d5   : > { %v2516_v30 = vpop.eup %2515  ;;  %2072 = vst.msk [vmem:[%s3603_s27 + $0x58] sm:$0xff] %vm610_vm0, %v2056_v57  ;;  %v2053_v3 = vadd.f32 %v3594_v38, %v2031_v49  ;;  %v2032_v62 = vmul.f32 %v3588_v23, %v2010_v59 }
 0x6d6   : > { %v2013_v9 = vmul.f32 %v2516_v30, %v3561_v51 }
 0x6d7   : > { %2069 = vst.msk [vmem:[%s3603_s27 + $0x40] sm:$0xff] %vm610_vm0, %v2053_v3  ;;  %v2054_v44 = vadd.f32 %v3594_v38, %v2032_v62 }
 0x6d8   : > { %v2518_v32 = vpop.eup %2517  ;;  %v2035_v24 = vmul.f32 %v3588_v23, %v2013_v9 }
 0x6d9   : > { %2070 = vst.msk [vmem:[%s3603_s27 + $0x48] sm:$0xff] %vm610_vm0, %v2054_v44  ;;  %v2014_v43 = vmul.f32 %v2518_v32, %v3565_v35 }
 0x6da   : > { %v2520_v18 = vpop.eup %2519  ;;  %v2057_v19 = vadd.f32 %v3594_v38, %v2035_v24 }
 0x6db   : > { %v2522_v52 = vpop.eup %2521  ;;  %v2036_v51 = vmul.f32 %v3588_v23, %v2014_v43  ;;  %v2015_v21 = vmul.f32 %v2520_v18, %v3570_v29 }
 0x6dc   : > { %2073 = vst.msk [vmem:[%s3603_s27 + $0x60] sm:$0xff] %vm610_vm0, %v2057_v19  ;;  %v2016_v63 = vmul.f32 %v2522_v52, %v3576_v12 }
 0x6dd   : > { %v2058_v20 = vadd.f32 %v3594_v38, %v2036_v51  ;;  %v2037_v61 = vmul.f32 %v3588_v23, %v2015_v21 }
 0x6de   : > { %v2038_v53 = vmul.f32 %v3588_v23, %v2016_v63 }
 0x6df   : > { %2074 = vst.msk [vmem:[%s3603_s27 + $0x68] sm:$0xff] %vm610_vm0, %v2058_v20  ;;  %v2059_v35 = vadd.f32 %v3594_v38, %v2037_v61 }
 0x6e0   : > { %v2060_v46 = vadd.f32 %v3594_v38, %v2038_v53 }
 0x6e1   : > { %2075 = vst.msk [vmem:[%s3603_s27 + $0x70] sm:$0xff] %vm610_vm0, %v2059_v35 }
 0x6e2   : > { %2076 = vst.msk [vmem:[%s3603_s27 + $0x78] sm:$0xff] %vm610_vm0, %v2060_v46 }
 0x6e3 PF: > { %s27_s24 = sadd.s32 1, %s2574_s24   ;;  %s3715_s16 = sld [smem:[#allocation3_spill]] }
 0x6e4   : > { %p24_p7 = scmp.ge.s32.totalorder %s27_s24, 6   ;;  %s3716_s17 = sld [smem:[#allocation4_spill]] }
 0x6e5   : > { %s3717_s20 = smov %s2566_s22  ;;  %s3718_s21 = smov %s2570_s23 }
 0x6e6   :  { %26 = sbr.rel (!%p24_p7) target bundleno = 3 (0x3), region = 116 }
 0x6e9   : > { %s3719_s22 = smov %s3715_s16 }
 0x6ea   : > { %s3720_s23 = smov %s3716_s17 }

</bundles_post_ra>
